<compile_context>
chip_gen: v7x
topology: tpu7x:2x2x1
jax: 0.10.0
libtpu: 0.0.40
codegen_flags: <defaults>
</compile_context>

<pallas_src>
import functools

import numpy as np
import jax
import jax.numpy as jnp
from jax.experimental import pallas as pl
from jax.experimental.pallas import tpu as pltpu


# ---------------------------------------------------------------------------
# Fused kernel: pe-MLP (folded affine + ReLU + Linear(3,Dh)) + sibling attention
# for one lane-tile of TN points.
#   q_ref (Dh, H, TN)   k_ref / v_ref (H, Dh, Kn, TN)   x_ref (3, Kn, TN)   o_ref (H, Dh, TN)
#   a1/c1/w2/b2 are small SMEM parameter tables.
# ---------------------------------------------------------------------------
def tree_attn_fused_kernel(a1_ref, c1_ref, w2_ref, b2_ref,
                           q_ref, k_ref, v_ref, x_ref, o_ref,
                           *, inv_denom, dh):
    x = x_ref[...]                                        # (3, Kn, TN)

    # --- fused pe MLP: (Linear(3,3)+BatchNorm1d) folded affine -> ReLU -> Linear(3, Dh)
    r = []
    for c in range(3):
        hc = (a1_ref[c, 0] * x[0] + a1_ref[c, 1] * x[1]
              + a1_ref[c, 2] * x[2] + c1_ref[c])
        r.append(jnp.maximum(hc, 0.0))                    # (Kn, TN)
    pe = []
    for d in range(dh):
        pe.append(w2_ref[d, 0] * r[0] + w2_ref[d, 1] * r[1]
                  + w2_ref[d, 2] * r[2] + b2_ref[d])      # (Kn, TN)
    pe_sum = pe[0]
    for d in range(1, dh):
        pe_sum = pe_sum + pe[d]                           # (Kn, TN) = sum_d pe[d]

    # --- scores: w[h, j] = (sum_d k[h,d,j]*q[d,h] + sum_d pe[j,d]) * inv_denom
    q = q_ref[...]                                        # (Dh, H, TN)
    k = k_ref[...]                                        # (H, Dh, Kn, TN)
    acc = k[:, 0, :, :] * q[0][:, None, :]                # leading-dim loop over Dh (VPU)
    for d in range(1, dh):
        acc = acc + k[:, d, :, :] * q[d][:, None, :]
    w = (acc + pe_sum[None, :, :]) * inv_denom            # (H, Kn, TN)

    # --- softmax over the Kn neighbours (axis=1)
    w = w - jnp.max(w, axis=1, keepdims=True)
    e = jnp.exp(w)
    a = e * pl.reciprocal(jnp.sum(e, axis=1, keepdims=True), approx=True)   # (H, Kn, TN)

    # --- weighted sum of (V + pe) over neighbours
    v = v_ref[...]                                        # (H, Dh, Kn, TN)
    pe_stack = jnp.stack(pe, axis=0)                      # (Dh, Kn, TN)  (leading-axis stack)
    o_ref[...] = jnp.sum((v + pe_stack[None, :, :, :]) * a[:, None, :, :], axis=2)


def tree_attention_siblings_pallas(q_t, k_t, v_t, peraw_t,
                                   w1, b1, gamma, beta, w2, b2,
                                   *, scale, heads, dh, kn, n_valid, tn=256,
                                   bn_eps=1e-5):
    """q_t (Dh,H,Npad), k_t/v_t (H,Dh,Kn,Npad), peraw_t (3,Kn,Npad). Returns (n_valid, H*Dh)."""
    n_pad = q_t.shape[-1]
    assert tn % 128 == 0 and n_pad % tn == 0, "pad N to a multiple of the 128-lane tile on the host"

    # BatchNorm1d training-mode batch statistics over the real N*Kn rows (tiny XLA reduction),
    # then fold Linear(3,3)+BN into one affine (a1, c1) passed to the kernel through SMEM.
    x = peraw_t[:, :, :n_valid]                           # (3, Kn, Nvalid)
    h = jnp.einsum('ci,ikn->ckn', w1, x) + b1[:, None, None]
    mean = jnp.mean(h, axis=(1, 2))
    var = jnp.mean((h - mean[:, None, None]) ** 2, axis=(1, 2))
    bn_scale = gamma * jax.lax.rsqrt(var + bn_eps)        # (3,)
    a1 = w1 * bn_scale[:, None]                           # (3, 3)
    c1 = (b1 - mean) * bn_scale + beta                    # (3,)

    inv_denom = 1.0 / (scale * kn + 1e-8)                 # hoisted scale (baked in at trace time)
    kernel = functools.partial(tree_attn_fused_kernel, inv_denom=inv_denom, dh=dh)

    smem = pl.BlockSpec(memory_space=pltpu.MemorySpace.SMEM)
    bytes_accessed = 4 * n_pad * (2 * heads * dh * kn + 2 * heads * dh + 3 * kn)
    out_t = pl.pallas_call(
        kernel,
        grid=(n_pad // tn,),
        in_specs=[smem, smem, smem, smem,
                  pl.BlockSpec((dh, heads, tn), lambda i: (0, 0, i)),
                  pl.BlockSpec((heads, dh, kn, tn), lambda i: (0, 0, 0, i)),
                  pl.BlockSpec((heads, dh, kn, tn), lambda i: (0, 0, 0, i)),
                  pl.BlockSpec((3, kn, tn), lambda i: (0, 0, i))],
        out_specs=pl.BlockSpec((heads, dh, tn), lambda i: (0, 0, i)),
        out_shape=jax.ShapeDtypeStruct((heads, dh, n_pad), jnp.float32),
        compiler_params=pltpu.CompilerParams(
            dimension_semantics=("parallel",),
            vmem_limit_bytes=32 * 1024 * 1024),
        cost_estimate=pl.CostEstimate(
            flops=12 * n_pad * kn * heads * dh,
            transcendentals=n_pad * kn * heads,
            bytes_accessed=bytes_accessed),
    )(a1, c1, w2, b2, q_t, k_t, v_t, peraw_t)

    out = out_t[:, :, :n_valid]                           # (H, Dh, Nvalid), trim host padding
    return out.transpose(2, 0, 1).reshape(n_valid, heads * dh)


# ---------------------------------------------------------------------------
# Host-side glue: per-batch k-NN + neighbour gather (the python loop in forward),
# plus transpose/pad into the lane-dense kernel layout.
# TODO(synk): the ragged per-batch query_knn_point gather is data-dependent; it stays on the host.
# ---------------------------------------------------------------------------
def build_neighbourhoods(p, Q, Kf, V, b, kn):
    qs, ks, vs, pes = [], [], [], []
    for i in range(int(b[-1]) + 1):
        m = b == i
        p_i = p[m]
        d = ((p_i[:, None, :] - p_i[None, :, :]) ** 2).sum(-1)
        kk = min(kn, p_i.shape[0])
        idx = np.argsort(d, axis=-1, kind="stable")[:, :kk]   # query_knn_point: self first
        if idx.shape[1] < kn:                                  # pad with the self index (torch branch)
            idx = np.concatenate(
                [idx, np.repeat(idx[:, :1], kn - idx.shape[1], axis=1)], axis=1)
        qs.append(Q[m])
        ks.append(Kf[m][idx])
        vs.append(V[m][idx])
        pes.append(p_i[:, None, :] - p_i[idx])
    return (np.concatenate(qs, 0).astype(np.float32),          # (N, dim)
            np.concatenate(ks, 0).astype(np.float32),          # (N, kn, dim)
            np.concatenate(vs, 0).astype(np.float32),          # (N, kn, dim)
            np.concatenate(pes, 0).astype(np.float32))         # (N, kn, 3)


def to_kernel_layout(q, k, v, pe_raw, heads, dh, kn, tn):
    """Points-on-lanes layout; pad N to a multiple of the lane tile."""
    n = q.shape[0]
    n_pad = -(-n // tn) * tn
    pad = n_pad - n
    qt = np.ascontiguousarray(q.reshape(n, heads, dh).transpose(2, 1, 0))         # (Dh, H, N)
    kt = np.ascontiguousarray(k.reshape(n, kn, heads, dh).transpose(2, 3, 1, 0))  # (H, Dh, Kn, N)
    vt = np.ascontiguousarray(v.reshape(n, kn, heads, dh).transpose(2, 3, 1, 0))  # (H, Dh, Kn, N)
    pt = np.ascontiguousarray(pe_raw.transpose(2, 1, 0))                          # (3, Kn, N)
    if pad:
        qt = np.pad(qt, [(0, 0), (0, 0), (0, pad)])
        kt = np.pad(kt, [(0, 0), (0, 0), (0, 0), (0, pad)])
        vt = np.pad(vt, [(0, 0), (0, 0), (0, 0), (0, pad)])
        pt = np.pad(pt, [(0, 0), (0, 0), (0, pad)])
    return qt, kt, vt, pt


if __name__ == "__main__":
    heads, dim, depth = 4, 32, 1
    dh = dim // heads
    kn = 16
    scale = float(dh) ** -0.5
    tn = 128                        # lane tile (multiple of 128); -> 2 grid steps below

    batch_sizes = [10, 150]         # first cloud has < kn points -> exercises the idx-padding branch
    N = sum(batch_sizes)

    key = jax.random.PRNGKey(0)
    ks_ = jax.random.split(key, 10)
    p = np.asarray(jax.random.normal(ks_[0], (N, 3), dtype=jnp.float32))
    Q = np.asarray(jax.random.normal(ks_[1], (N, dim), dtype=jnp.float32))
    Kf = np.asarray(jax.random.normal(ks_[2], (N, dim), dtype=jnp.float32))
    V = np.asarray(jax.random.normal(ks_[3], (N, dim), dtype=jnp.float32))
    b = np.concatenate([np.full(s, i, dtype=np.int32) for i, s in enumerate(batch_sizes)])

    # pe_mlp parameters: Linear(3,3), BatchNorm1d(3), Linear(3, dh) -- deterministic init.
    w1 = np.asarray(jax.random.normal(ks_[4], (3, 3), dtype=jnp.float32)) * 0.5
    b1 = np.asarray(jax.random.normal(ks_[5], (3,), dtype=jnp.float32)) * 0.1
    gamma = 1.0 + 0.1 * np.asarray(jax.random.normal(ks_[6], (3,), dtype=jnp.float32))
    beta = 0.1 * np.asarray(jax.random.normal(ks_[7], (3,), dtype=jnp.float32))
    w2 = np.asarray(jax.random.normal(ks_[8], (dh, 3), dtype=jnp.float32)) * 0.5
    b2 = np.asarray(jax.random.normal(ks_[9], (dh,), dtype=jnp.float32)) * 0.1

    # host glue: ragged k-NN + gather, then lane-dense layout + padding
    q_np, k_np, v_np, pe_raw = build_neighbourhoods(p, Q, Kf, V, b, kn)
    q_t, k_t, v_t, pe_t = to_kernel_layout(q_np, k_np, v_np, pe_raw, heads, dh, kn, tn)

    # ---- Pallas path ----
    out = tree_attention_siblings_pallas(
        jnp.asarray(q_t), jnp.asarray(k_t), jnp.asarray(v_t), jnp.asarray(pe_t),
        jnp.asarray(w1), jnp.asarray(b1), jnp.asarray(gamma), jnp.asarray(beta),
        jnp.asarray(w2), jnp.asarray(b2),
        scale=scale, heads=heads, dh=dh, kn=kn, n_valid=N, tn=tn)
    out = np.asarray(jax.block_until_ready(out))              # (N, dim)

    # ---- NumPy reference (mirrors the torch forward, BatchNorm1d in training mode) ----
    h = pe_raw.reshape(-1, 3) @ w1.T + b1
    mu = h.mean(0)
    var = ((h - mu) ** 2).mean(0)
    h = np.maximum((h - mu) / np.sqrt(var + 1e-5) * gamma + beta, 0.0)
    pe_ref = (h @ w2.T + b2).reshape(N, kn, dh)
    qr = q_np.reshape(N, 1, heads, dh)
    kr = k_np.reshape(N, kn, heads, dh)
    vr = v_np.reshape(N, kn, heads, dh)
    wr = (kr * qr + pe_ref[:, :, None, :]) / (scale * kn + 1e-8)
    wr = wr.sum(-1, keepdims=True)
    wr = wr - wr.max(axis=1, keepdims=True)
    ar = np.exp(wr)
    ar = ar / ar.sum(axis=1, keepdims=True)
    out_ref = ((vr + pe_ref[:, :, None, :]) * ar).sum(1).reshape(N, heads * dh)

    np.testing.assert_allclose(out, out_ref, rtol=2e-3, atol=2e-3)
    print("KERNEL_OK")
</pallas_src>

<mosaic_0001>
module attributes {stable_mosaic.version = 11 : i64} {
  func.func @tree_attn_fused_kernel(%arg0: i32, %arg1: memref<3x3xf32, #tpu.memory_space<smem>>, %arg2: memref<3xf32, #tpu.memory_space<smem>>, %arg3: memref<8x3xf32, #tpu.memory_space<smem>>, %arg4: memref<8xf32, #tpu.memory_space<smem>>, %arg5: memref<8x4x128xf32, #tpu.memory_space<vmem>>, %arg6: memref<4x8x16x128xf32, #tpu.memory_space<vmem>>, %arg7: memref<4x8x16x128xf32, #tpu.memory_space<vmem>>, %arg8: memref<3x16x128xf32, #tpu.memory_space<vmem>>, %arg9: memref<4x8x128xf32, #tpu.memory_space<vmem>>) attributes {dimension_semantics = [#tpu.dimension_semantics<parallel>], iteration_bounds = array<i64: 2>, scalar_prefetch = 0 : i64, scratch_operands = 0 : i64, tpu.core_type = #tpu.core_type<tc>, window_params = [{transform_indices = @transform_0, window_bounds = array<i64: 3, 3>}, {transform_indices = @transform_1, window_bounds = array<i64: 3>}, {transform_indices = @transform_2, window_bounds = array<i64: 8, 3>}, {transform_indices = @transform_3, window_bounds = array<i64: 8>}, {transform_indices = @transform_4, window_bounds = array<i64: 8, 4, 128>}, {transform_indices = @transform_5, window_bounds = array<i64: 4, 8, 16, 128>}, {transform_indices = @transform_6, window_bounds = array<i64: 4, 8, 16, 128>}, {transform_indices = @transform_7, window_bounds = array<i64: 3, 16, 128>}, {transform_indices = @transform_8, window_bounds = array<i64: 4, 8, 128>}]} {
    %c0 = arith.constant 0 : index
    %c0_0 = arith.constant 0 : index
    %c0_1 = arith.constant 0 : index
    %0 = vector.load %arg8[%c0, %c0_0, %c0_1] : memref<3x16x128xf32, #tpu.memory_space<vmem>>, vector<3x16x128xf32>
    %c0_2 = arith.constant 0 : index
    %c0_3 = arith.constant 0 : index
    %1 = memref.load %arg1[%c0_2, %c0_3] : memref<3x3xf32, #tpu.memory_space<smem>>
    %2 = vector.extract_strided_slice %0 {offsets = [0, 0, 0], sizes = [1, 16, 128], strides = [1, 1, 1]} : vector<3x16x128xf32> to vector<1x16x128xf32>
    %3 = vector.shape_cast %2 : vector<1x16x128xf32> to vector<16x128xf32>
    %4 = vector.broadcast %1 : f32 to vector<16x128xf32>
    %5 = arith.mulf %4, %3 : vector<16x128xf32>
    %c0_4 = arith.constant 0 : index
    %c1 = arith.constant 1 : index
    %6 = memref.load %arg1[%c0_4, %c1] : memref<3x3xf32, #tpu.memory_space<smem>>
    %7 = vector.extract_strided_slice %0 {offsets = [1, 0, 0], sizes = [1, 16, 128], strides = [1, 1, 1]} : vector<3x16x128xf32> to vector<1x16x128xf32>
    %8 = vector.shape_cast %7 : vector<1x16x128xf32> to vector<16x128xf32>
    %9 = vector.broadcast %6 : f32 to vector<16x128xf32>
    %10 = arith.mulf %9, %8 : vector<16x128xf32>
    %11 = arith.addf %5, %10 : vector<16x128xf32>
    %c0_5 = arith.constant 0 : index
    %c2 = arith.constant 2 : index
    %12 = memref.load %arg1[%c0_5, %c2] : memref<3x3xf32, #tpu.memory_space<smem>>
    %13 = vector.extract_strided_slice %0 {offsets = [2, 0, 0], sizes = [1, 16, 128], strides = [1, 1, 1]} : vector<3x16x128xf32> to vector<1x16x128xf32>
    %14 = vector.shape_cast %13 : vector<1x16x128xf32> to vector<16x128xf32>
    %15 = vector.broadcast %12 : f32 to vector<16x128xf32>
    %16 = arith.mulf %15, %14 : vector<16x128xf32>
    %17 = arith.addf %11, %16 : vector<16x128xf32>
    %c0_6 = arith.constant 0 : index
    %18 = memref.load %arg2[%c0_6] : memref<3xf32, #tpu.memory_space<smem>>
    %19 = vector.broadcast %18 : f32 to vector<16x128xf32>
    %20 = arith.addf %17, %19 : vector<16x128xf32>
    %cst = arith.constant 0.000000e+00 : f32
    %21 = vector.broadcast %cst : f32 to vector<16x128xf32>
    %22 = arith.maximumf %20, %21 : vector<16x128xf32>
    %c1_7 = arith.constant 1 : index
    %c0_8 = arith.constant 0 : index
    %23 = memref.load %arg1[%c1_7, %c0_8] : memref<3x3xf32, #tpu.memory_space<smem>>
    %24 = vector.extract_strided_slice %0 {offsets = [0, 0, 0], sizes = [1, 16, 128], strides = [1, 1, 1]} : vector<3x16x128xf32> to vector<1x16x128xf32>
    %25 = vector.shape_cast %24 : vector<1x16x128xf32> to vector<16x128xf32>
    %26 = vector.broadcast %23 : f32 to vector<16x128xf32>
    %27 = arith.mulf %26, %25 : vector<16x128xf32>
    %c1_9 = arith.constant 1 : index
    %c1_10 = arith.constant 1 : index
    %28 = memref.load %arg1[%c1_9, %c1_10] : memref<3x3xf32, #tpu.memory_space<smem>>
    %29 = vector.extract_strided_slice %0 {offsets = [1, 0, 0], sizes = [1, 16, 128], strides = [1, 1, 1]} : vector<3x16x128xf32> to vector<1x16x128xf32>
    %30 = vector.shape_cast %29 : vector<1x16x128xf32> to vector<16x128xf32>
    %31 = vector.broadcast %28 : f32 to vector<16x128xf32>
    %32 = arith.mulf %31, %30 : vector<16x128xf32>
    %33 = arith.addf %27, %32 : vector<16x128xf32>
    %c1_11 = arith.constant 1 : index
    %c2_12 = arith.constant 2 : index
    %34 = memref.load %arg1[%c1_11, %c2_12] : memref<3x3xf32, #tpu.memory_space<smem>>
    %35 = vector.extract_strided_slice %0 {offsets = [2, 0, 0], sizes = [1, 16, 128], strides = [1, 1, 1]} : vector<3x16x128xf32> to vector<1x16x128xf32>
    %36 = vector.shape_cast %35 : vector<1x16x128xf32> to vector<16x128xf32>
    %37 = vector.broadcast %34 : f32 to vector<16x128xf32>
    %38 = arith.mulf %37, %36 : vector<16x128xf32>
    %39 = arith.addf %33, %38 : vector<16x128xf32>
    %c1_13 = arith.constant 1 : index
    %40 = memref.load %arg2[%c1_13] : memref<3xf32, #tpu.memory_space<smem>>
    %41 = vector.broadcast %40 : f32 to vector<16x128xf32>
    %42 = arith.addf %39, %41 : vector<16x128xf32>
    %cst_14 = arith.constant 0.000000e+00 : f32
    %43 = vector.broadcast %cst_14 : f32 to vector<16x128xf32>
    %44 = arith.maximumf %42, %43 : vector<16x128xf32>
    %c2_15 = arith.constant 2 : index
    %c0_16 = arith.constant 0 : index
    %45 = memref.load %arg1[%c2_15, %c0_16] : memref<3x3xf32, #tpu.memory_space<smem>>
    %46 = vector.extract_strided_slice %0 {offsets = [0, 0, 0], sizes = [1, 16, 128], strides = [1, 1, 1]} : vector<3x16x128xf32> to vector<1x16x128xf32>
    %47 = vector.shape_cast %46 : vector<1x16x128xf32> to vector<16x128xf32>
    %48 = vector.broadcast %45 : f32 to vector<16x128xf32>
    %49 = arith.mulf %48, %47 : vector<16x128xf32>
    %c2_17 = arith.constant 2 : index
    %c1_18 = arith.constant 1 : index
    %50 = memref.load %arg1[%c2_17, %c1_18] : memref<3x3xf32, #tpu.memory_space<smem>>
    %51 = vector.extract_strided_slice %0 {offsets = [1, 0, 0], sizes = [1, 16, 128], strides = [1, 1, 1]} : vector<3x16x128xf32> to vector<1x16x128xf32>
    %52 = vector.shape_cast %51 : vector<1x16x128xf32> to vector<16x128xf32>
    %53 = vector.broadcast %50 : f32 to vector<16x128xf32>
    %54 = arith.mulf %53, %52 : vector<16x128xf32>
    %55 = arith.addf %49, %54 : vector<16x128xf32>
    %c2_19 = arith.constant 2 : index
    %c2_20 = arith.constant 2 : index
    %56 = memref.load %arg1[%c2_19, %c2_20] : memref<3x3xf32, #tpu.memory_space<smem>>
    %57 = vector.extract_strided_slice %0 {offsets = [2, 0, 0], sizes = [1, 16, 128], strides = [1, 1, 1]} : vector<3x16x128xf32> to vector<1x16x128xf32>
    %58 = vector.shape_cast %57 : vector<1x16x128xf32> to vector<16x128xf32>
    %59 = vector.broadcast %56 : f32 to vector<16x128xf32>
    %60 = arith.mulf %59, %58 : vector<16x128xf32>
    %61 = arith.addf %55, %60 : vector<16x128xf32>
    %c2_21 = arith.constant 2 : index
    %62 = memref.load %arg2[%c2_21] : memref<3xf32, #tpu.memory_space<smem>>
    %63 = vector.broadcast %62 : f32 to vector<16x128xf32>
    %64 = arith.addf %61, %63 : vector<16x128xf32>
    %cst_22 = arith.constant 0.000000e+00 : f32
    %65 = vector.broadcast %cst_22 : f32 to vector<16x128xf32>
    %66 = arith.maximumf %64, %65 : vector<16x128xf32>
    %c0_23 = arith.constant 0 : index
    %c0_24 = arith.constant 0 : index
    %67 = memref.load %arg3[%c0_23, %c0_24] : memref<8x3xf32, #tpu.memory_space<smem>>
    %68 = vector.broadcast %67 : f32 to vector<16x128xf32>
    %69 = arith.mulf %68, %22 : vector<16x128xf32>
    %c0_25 = arith.constant 0 : index
    %c1_26 = arith.constant 1 : index
    %70 = memref.load %arg3[%c0_25, %c1_26] : memref<8x3xf32, #tpu.memory_space<smem>>
    %71 = vector.broadcast %70 : f32 to vector<16x128xf32>
    %72 = arith.mulf %71, %44 : vector<16x128xf32>
    %73 = arith.addf %69, %72 : vector<16x128xf32>
    %c0_27 = arith.constant 0 : index
    %c2_28 = arith.constant 2 : index
    %74 = memref.load %arg3[%c0_27, %c2_28] : memref<8x3xf32, #tpu.memory_space<smem>>
    %75 = vector.broadcast %74 : f32 to vector<16x128xf32>
    %76 = arith.mulf %75, %66 : vector<16x128xf32>
    %77 = arith.addf %73, %76 : vector<16x128xf32>
    %c0_29 = arith.constant 0 : index
    %78 = memref.load %arg4[%c0_29] : memref<8xf32, #tpu.memory_space<smem>>
    %79 = vector.broadcast %78 : f32 to vector<16x128xf32>
    %80 = arith.addf %77, %79 : vector<16x128xf32>
    %c1_30 = arith.constant 1 : index
    %c0_31 = arith.constant 0 : index
    %81 = memref.load %arg3[%c1_30, %c0_31] : memref<8x3xf32, #tpu.memory_space<smem>>
    %82 = vector.broadcast %81 : f32 to vector<16x128xf32>
    %83 = arith.mulf %82, %22 : vector<16x128xf32>
    %c1_32 = arith.constant 1 : index
    %c1_33 = arith.constant 1 : index
    %84 = memref.load %arg3[%c1_32, %c1_33] : memref<8x3xf32, #tpu.memory_space<smem>>
    %85 = vector.broadcast %84 : f32 to vector<16x128xf32>
    %86 = arith.mulf %85, %44 : vector<16x128xf32>
    %87 = arith.addf %83, %86 : vector<16x128xf32>
    %c1_34 = arith.constant 1 : index
    %c2_35 = arith.constant 2 : index
    %88 = memref.load %arg3[%c1_34, %c2_35] : memref<8x3xf32, #tpu.memory_space<smem>>
    %89 = vector.broadcast %88 : f32 to vector<16x128xf32>
    %90 = arith.mulf %89, %66 : vector<16x128xf32>
    %91 = arith.addf %87, %90 : vector<16x128xf32>
    %c1_36 = arith.constant 1 : index
    %92 = memref.load %arg4[%c1_36] : memref<8xf32, #tpu.memory_space<smem>>
    %93 = vector.broadcast %92 : f32 to vector<16x128xf32>
    %94 = arith.addf %91, %93 : vector<16x128xf32>
    %c2_37 = arith.constant 2 : index
    %c0_38 = arith.constant 0 : index
    %95 = memref.load %arg3[%c2_37, %c0_38] : memref<8x3xf32, #tpu.memory_space<smem>>
    %96 = vector.broadcast %95 : f32 to vector<16x128xf32>
    %97 = arith.mulf %96, %22 : vector<16x128xf32>
    %c2_39 = arith.constant 2 : index
    %c1_40 = arith.constant 1 : index
    %98 = memref.load %arg3[%c2_39, %c1_40] : memref<8x3xf32, #tpu.memory_space<smem>>
    %99 = vector.broadcast %98 : f32 to vector<16x128xf32>
    %100 = arith.mulf %99, %44 : vector<16x128xf32>
    %101 = arith.addf %97, %100 : vector<16x128xf32>
    %c2_41 = arith.constant 2 : index
    %c2_42 = arith.constant 2 : index
    %102 = memref.load %arg3[%c2_41, %c2_42] : memref<8x3xf32, #tpu.memory_space<smem>>
    %103 = vector.broadcast %102 : f32 to vector<16x128xf32>
    %104 = arith.mulf %103, %66 : vector<16x128xf32>
    %105 = arith.addf %101, %104 : vector<16x128xf32>
    %c2_43 = arith.constant 2 : index
    %106 = memref.load %arg4[%c2_43] : memref<8xf32, #tpu.memory_space<smem>>
    %107 = vector.broadcast %106 : f32 to vector<16x128xf32>
    %108 = arith.addf %105, %107 : vector<16x128xf32>
    %c3 = arith.constant 3 : index
    %c0_44 = arith.constant 0 : index
    %109 = memref.load %arg3[%c3, %c0_44] : memref<8x3xf32, #tpu.memory_space<smem>>
    %110 = vector.broadcast %109 : f32 to vector<16x128xf32>
    %111 = arith.mulf %110, %22 : vector<16x128xf32>
    %c3_45 = arith.constant 3 : index
    %c1_46 = arith.constant 1 : index
    %112 = memref.load %arg3[%c3_45, %c1_46] : memref<8x3xf32, #tpu.memory_space<smem>>
    %113 = vector.broadcast %112 : f32 to vector<16x128xf32>
    %114 = arith.mulf %113, %44 : vector<16x128xf32>
    %115 = arith.addf %111, %114 : vector<16x128xf32>
    %c3_47 = arith.constant 3 : index
    %c2_48 = arith.constant 2 : index
    %116 = memref.load %arg3[%c3_47, %c2_48] : memref<8x3xf32, #tpu.memory_space<smem>>
    %117 = vector.broadcast %116 : f32 to vector<16x128xf32>
    %118 = arith.mulf %117, %66 : vector<16x128xf32>
    %119 = arith.addf %115, %118 : vector<16x128xf32>
    %c3_49 = arith.constant 3 : index
    %120 = memref.load %arg4[%c3_49] : memref<8xf32, #tpu.memory_space<smem>>
    %121 = vector.broadcast %120 : f32 to vector<16x128xf32>
    %122 = arith.addf %119, %121 : vector<16x128xf32>
    %c4 = arith.constant 4 : index
    %c0_50 = arith.constant 0 : index
    %123 = memref.load %arg3[%c4, %c0_50] : memref<8x3xf32, #tpu.memory_space<smem>>
    %124 = vector.broadcast %123 : f32 to vector<16x128xf32>
    %125 = arith.mulf %124, %22 : vector<16x128xf32>
    %c4_51 = arith.constant 4 : index
    %c1_52 = arith.constant 1 : index
    %126 = memref.load %arg3[%c4_51, %c1_52] : memref<8x3xf32, #tpu.memory_space<smem>>
    %127 = vector.broadcast %126 : f32 to vector<16x128xf32>
    %128 = arith.mulf %127, %44 : vector<16x128xf32>
    %129 = arith.addf %125, %128 : vector<16x128xf32>
    %c4_53 = arith.constant 4 : index
    %c2_54 = arith.constant 2 : index
    %130 = memref.load %arg3[%c4_53, %c2_54] : memref<8x3xf32, #tpu.memory_space<smem>>
    %131 = vector.broadcast %130 : f32 to vector<16x128xf32>
    %132 = arith.mulf %131, %66 : vector<16x128xf32>
    %133 = arith.addf %129, %132 : vector<16x128xf32>
    %c4_55 = arith.constant 4 : index
    %134 = memref.load %arg4[%c4_55] : memref<8xf32, #tpu.memory_space<smem>>
    %135 = vector.broadcast %134 : f32 to vector<16x128xf32>
    %136 = arith.addf %133, %135 : vector<16x128xf32>
    %c5 = arith.constant 5 : index
    %c0_56 = arith.constant 0 : index
    %137 = memref.load %arg3[%c5, %c0_56] : memref<8x3xf32, #tpu.memory_space<smem>>
    %138 = vector.broadcast %137 : f32 to vector<16x128xf32>
    %139 = arith.mulf %138, %22 : vector<16x128xf32>
    %c5_57 = arith.constant 5 : index
    %c1_58 = arith.constant 1 : index
    %140 = memref.load %arg3[%c5_57, %c1_58] : memref<8x3xf32, #tpu.memory_space<smem>>
    %141 = vector.broadcast %140 : f32 to vector<16x128xf32>
    %142 = arith.mulf %141, %44 : vector<16x128xf32>
    %143 = arith.addf %139, %142 : vector<16x128xf32>
    %c5_59 = arith.constant 5 : index
    %c2_60 = arith.constant 2 : index
    %144 = memref.load %arg3[%c5_59, %c2_60] : memref<8x3xf32, #tpu.memory_space<smem>>
    %145 = vector.broadcast %144 : f32 to vector<16x128xf32>
    %146 = arith.mulf %145, %66 : vector<16x128xf32>
    %147 = arith.addf %143, %146 : vector<16x128xf32>
    %c5_61 = arith.constant 5 : index
    %148 = memref.load %arg4[%c5_61] : memref<8xf32, #tpu.memory_space<smem>>
    %149 = vector.broadcast %148 : f32 to vector<16x128xf32>
    %150 = arith.addf %147, %149 : vector<16x128xf32>
    %c6 = arith.constant 6 : index
    %c0_62 = arith.constant 0 : index
    %151 = memref.load %arg3[%c6, %c0_62] : memref<8x3xf32, #tpu.memory_space<smem>>
    %152 = vector.broadcast %151 : f32 to vector<16x128xf32>
    %153 = arith.mulf %152, %22 : vector<16x128xf32>
    %c6_63 = arith.constant 6 : index
    %c1_64 = arith.constant 1 : index
    %154 = memref.load %arg3[%c6_63, %c1_64] : memref<8x3xf32, #tpu.memory_space<smem>>
    %155 = vector.broadcast %154 : f32 to vector<16x128xf32>
    %156 = arith.mulf %155, %44 : vector<16x128xf32>
    %157 = arith.addf %153, %156 : vector<16x128xf32>
    %c6_65 = arith.constant 6 : index
    %c2_66 = arith.constant 2 : index
    %158 = memref.load %arg3[%c6_65, %c2_66] : memref<8x3xf32, #tpu.memory_space<smem>>
    %159 = vector.broadcast %158 : f32 to vector<16x128xf32>
    %160 = arith.mulf %159, %66 : vector<16x128xf32>
    %161 = arith.addf %157, %160 : vector<16x128xf32>
    %c6_67 = arith.constant 6 : index
    %162 = memref.load %arg4[%c6_67] : memref<8xf32, #tpu.memory_space<smem>>
    %163 = vector.broadcast %162 : f32 to vector<16x128xf32>
    %164 = arith.addf %161, %163 : vector<16x128xf32>
    %c7 = arith.constant 7 : index
    %c0_68 = arith.constant 0 : index
    %165 = memref.load %arg3[%c7, %c0_68] : memref<8x3xf32, #tpu.memory_space<smem>>
    %166 = vector.broadcast %165 : f32 to vector<16x128xf32>
    %167 = arith.mulf %166, %22 : vector<16x128xf32>
    %c7_69 = arith.constant 7 : index
    %c1_70 = arith.constant 1 : index
    %168 = memref.load %arg3[%c7_69, %c1_70] : memref<8x3xf32, #tpu.memory_space<smem>>
    %169 = vector.broadcast %168 : f32 to vector<16x128xf32>
    %170 = arith.mulf %169, %44 : vector<16x128xf32>
    %171 = arith.addf %167, %170 : vector<16x128xf32>
    %c7_71 = arith.constant 7 : index
    %c2_72 = arith.constant 2 : index
    %172 = memref.load %arg3[%c7_71, %c2_72] : memref<8x3xf32, #tpu.memory_space<smem>>
    %173 = vector.broadcast %172 : f32 to vector<16x128xf32>
    %174 = arith.mulf %173, %66 : vector<16x128xf32>
    %175 = arith.addf %171, %174 : vector<16x128xf32>
    %c7_73 = arith.constant 7 : index
    %176 = memref.load %arg4[%c7_73] : memref<8xf32, #tpu.memory_space<smem>>
    %177 = vector.broadcast %176 : f32 to vector<16x128xf32>
    %178 = arith.addf %175, %177 : vector<16x128xf32>
    %179 = arith.addf %80, %94 : vector<16x128xf32>
    %180 = arith.addf %179, %108 : vector<16x128xf32>
    %181 = arith.addf %180, %122 : vector<16x128xf32>
    %182 = arith.addf %181, %136 : vector<16x128xf32>
    %183 = arith.addf %182, %150 : vector<16x128xf32>
    %184 = arith.addf %183, %164 : vector<16x128xf32>
    %185 = arith.addf %184, %178 : vector<16x128xf32>
    %c0_74 = arith.constant 0 : index
    %c0_75 = arith.constant 0 : index
    %c0_76 = arith.constant 0 : index
    %186 = vector.load %arg5[%c0_74, %c0_75, %c0_76] : memref<8x4x128xf32, #tpu.memory_space<vmem>>, vector<8x4x128xf32>
    %c0_77 = arith.constant 0 : index
    %c0_78 = arith.constant 0 : index
    %c0_79 = arith.constant 0 : index
    %c0_80 = arith.constant 0 : index
    %187 = vector.load %arg6[%c0_77, %c0_78, %c0_79, %c0_80] : memref<4x8x16x128xf32, #tpu.memory_space<vmem>>, vector<4x8x16x128xf32>
    %188 = vector.extract_strided_slice %187 {offsets = [0, 0, 0, 0], sizes = [4, 1, 16, 128], strides = [1, 1, 1, 1]} : vector<4x8x16x128xf32> to vector<4x1x16x128xf32>
    %189 = vector.shape_cast %188 : vector<4x1x16x128xf32> to vector<4x16x128xf32>
    %190 = vector.extract_strided_slice %186 {offsets = [0, 0, 0], sizes = [1, 4, 128], strides = [1, 1, 1]} : vector<8x4x128xf32> to vector<1x4x128xf32>
    %191 = vector.shape_cast %190 : vector<1x4x128xf32> to vector<4x128xf32>
    %192 = vector.shape_cast %191 : vector<4x128xf32> to vector<4x1x128xf32>
    %193 = vector.broadcast %192 : vector<4x1x128xf32> to vector<4x16x128xf32>
    %194 = arith.mulf %189, %193 : vector<4x16x128xf32>
    %195 = vector.extract_strided_slice %187 {offsets = [0, 1, 0, 0], sizes = [4, 1, 16, 128], strides = [1, 1, 1, 1]} : vector<4x8x16x128xf32> to vector<4x1x16x128xf32>
    %196 = vector.shape_cast %195 : vector<4x1x16x128xf32> to vector<4x16x128xf32>
    %197 = vector.extract_strided_slice %186 {offsets = [1, 0, 0], sizes = [1, 4, 128], strides = [1, 1, 1]} : vector<8x4x128xf32> to vector<1x4x128xf32>
    %198 = vector.shape_cast %197 : vector<1x4x128xf32> to vector<4x128xf32>
    %199 = vector.shape_cast %198 : vector<4x128xf32> to vector<4x1x128xf32>
    %200 = vector.broadcast %199 : vector<4x1x128xf32> to vector<4x16x128xf32>
    %201 = arith.mulf %196, %200 : vector<4x16x128xf32>
    %202 = arith.addf %194, %201 : vector<4x16x128xf32>
    %203 = vector.extract_strided_slice %187 {offsets = [0, 2, 0, 0], sizes = [4, 1, 16, 128], strides = [1, 1, 1, 1]} : vector<4x8x16x128xf32> to vector<4x1x16x128xf32>
    %204 = vector.shape_cast %203 : vector<4x1x16x128xf32> to vector<4x16x128xf32>
    %205 = vector.extract_strided_slice %186 {offsets = [2, 0, 0], sizes = [1, 4, 128], strides = [1, 1, 1]} : vector<8x4x128xf32> to vector<1x4x128xf32>
    %206 = vector.shape_cast %205 : vector<1x4x128xf32> to vector<4x128xf32>
    %207 = vector.shape_cast %206 : vector<4x128xf32> to vector<4x1x128xf32>
    %208 = vector.broadcast %207 : vector<4x1x128xf32> to vector<4x16x128xf32>
    %209 = arith.mulf %204, %208 : vector<4x16x128xf32>
    %210 = arith.addf %202, %209 : vector<4x16x128xf32>
    %211 = vector.extract_strided_slice %187 {offsets = [0, 3, 0, 0], sizes = [4, 1, 16, 128], strides = [1, 1, 1, 1]} : vector<4x8x16x128xf32> to vector<4x1x16x128xf32>
    %212 = vector.shape_cast %211 : vector<4x1x16x128xf32> to vector<4x16x128xf32>
    %213 = vector.extract_strided_slice %186 {offsets = [3, 0, 0], sizes = [1, 4, 128], strides = [1, 1, 1]} : vector<8x4x128xf32> to vector<1x4x128xf32>
    %214 = vector.shape_cast %213 : vector<1x4x128xf32> to vector<4x128xf32>
    %215 = vector.shape_cast %214 : vector<4x128xf32> to vector<4x1x128xf32>
    %216 = vector.broadcast %215 : vector<4x1x128xf32> to vector<4x16x128xf32>
    %217 = arith.mulf %212, %216 : vector<4x16x128xf32>
    %218 = arith.addf %210, %217 : vector<4x16x128xf32>
    %219 = vector.extract_strided_slice %187 {offsets = [0, 4, 0, 0], sizes = [4, 1, 16, 128], strides = [1, 1, 1, 1]} : vector<4x8x16x128xf32> to vector<4x1x16x128xf32>
    %220 = vector.shape_cast %219 : vector<4x1x16x128xf32> to vector<4x16x128xf32>
    %221 = vector.extract_strided_slice %186 {offsets = [4, 0, 0], sizes = [1, 4, 128], strides = [1, 1, 1]} : vector<8x4x128xf32> to vector<1x4x128xf32>
    %222 = vector.shape_cast %221 : vector<1x4x128xf32> to vector<4x128xf32>
    %223 = vector.shape_cast %222 : vector<4x128xf32> to vector<4x1x128xf32>
    %224 = vector.broadcast %223 : vector<4x1x128xf32> to vector<4x16x128xf32>
    %225 = arith.mulf %220, %224 : vector<4x16x128xf32>
    %226 = arith.addf %218, %225 : vector<4x16x128xf32>
    %227 = vector.extract_strided_slice %187 {offsets = [0, 5, 0, 0], sizes = [4, 1, 16, 128], strides = [1, 1, 1, 1]} : vector<4x8x16x128xf32> to vector<4x1x16x128xf32>
    %228 = vector.shape_cast %227 : vector<4x1x16x128xf32> to vector<4x16x128xf32>
    %229 = vector.extract_strided_slice %186 {offsets = [5, 0, 0], sizes = [1, 4, 128], strides = [1, 1, 1]} : vector<8x4x128xf32> to vector<1x4x128xf32>
    %230 = vector.shape_cast %229 : vector<1x4x128xf32> to vector<4x128xf32>
    %231 = vector.shape_cast %230 : vector<4x128xf32> to vector<4x1x128xf32>
    %232 = vector.broadcast %231 : vector<4x1x128xf32> to vector<4x16x128xf32>
    %233 = arith.mulf %228, %232 : vector<4x16x128xf32>
    %234 = arith.addf %226, %233 : vector<4x16x128xf32>
    %235 = vector.extract_strided_slice %187 {offsets = [0, 6, 0, 0], sizes = [4, 1, 16, 128], strides = [1, 1, 1, 1]} : vector<4x8x16x128xf32> to vector<4x1x16x128xf32>
    %236 = vector.shape_cast %235 : vector<4x1x16x128xf32> to vector<4x16x128xf32>
    %237 = vector.extract_strided_slice %186 {offsets = [6, 0, 0], sizes = [1, 4, 128], strides = [1, 1, 1]} : vector<8x4x128xf32> to vector<1x4x128xf32>
    %238 = vector.shape_cast %237 : vector<1x4x128xf32> to vector<4x128xf32>
    %239 = vector.shape_cast %238 : vector<4x128xf32> to vector<4x1x128xf32>
    %240 = vector.broadcast %239 : vector<4x1x128xf32> to vector<4x16x128xf32>
    %241 = arith.mulf %236, %240 : vector<4x16x128xf32>
    %242 = arith.addf %234, %241 : vector<4x16x128xf32>
    %243 = vector.extract_strided_slice %187 {offsets = [0, 7, 0, 0], sizes = [4, 1, 16, 128], strides = [1, 1, 1, 1]} : vector<4x8x16x128xf32> to vector<4x1x16x128xf32>
    %244 = vector.shape_cast %243 : vector<4x1x16x128xf32> to vector<4x16x128xf32>
    %245 = vector.extract_strided_slice %186 {offsets = [7, 0, 0], sizes = [1, 4, 128], strides = [1, 1, 1]} : vector<8x4x128xf32> to vector<1x4x128xf32>
    %246 = vector.shape_cast %245 : vector<1x4x128xf32> to vector<4x128xf32>
    %247 = vector.shape_cast %246 : vector<4x128xf32> to vector<4x1x128xf32>
    %248 = vector.broadcast %247 : vector<4x1x128xf32> to vector<4x16x128xf32>
    %249 = arith.mulf %244, %248 : vector<4x16x128xf32>
    %250 = arith.addf %242, %249 : vector<4x16x128xf32>
    %251 = vector.shape_cast %185 : vector<16x128xf32> to vector<1x16x128xf32>
    %252 = vector.broadcast %251 : vector<1x16x128xf32> to vector<4x16x128xf32>
    %253 = arith.addf %250, %252 : vector<4x16x128xf32>
    %cst_81 = arith.constant 0.176776692 : f32
    %254 = vector.broadcast %cst_81 : f32 to vector<4x16x128xf32>
    %255 = arith.mulf %253, %254 : vector<4x16x128xf32>
    %cst_82 = arith.constant dense<0xFF800000> : vector<4x128xf32>
    %256 = vector.multi_reduction <maximumf>, %255, %cst_82 [1] : vector<4x16x128xf32> to vector<4x128xf32>
    %257 = vector.shape_cast %256 : vector<4x128xf32> to vector<4x1x128xf32>
    %258 = vector.broadcast %257 : vector<4x1x128xf32> to vector<4x16x128xf32>
    %259 = arith.subf %255, %258 : vector<4x16x128xf32>
    %260 = math.exp %259 : vector<4x16x128xf32>
    %cst_83 = arith.constant dense<0.000000e+00> : vector<4x128xf32>
    %261 = vector.multi_reduction <add>, %260, %cst_83 [1] : vector<4x16x128xf32> to vector<4x128xf32>
    %262 = vector.shape_cast %261 : vector<4x128xf32> to vector<4x1x128xf32>
    %263 = tpu.reciprocal %262 {approx = true} : vector<4x1x128xf32> -> vector<4x1x128xf32>
    %264 = vector.broadcast %263 : vector<4x1x128xf32> to vector<4x16x128xf32>
    %265 = arith.mulf %260, %264 : vector<4x16x128xf32>
    %c0_84 = arith.constant 0 : index
    %c0_85 = arith.constant 0 : index
    %c0_86 = arith.constant 0 : index
    %c0_87 = arith.constant 0 : index
    %266 = vector.load %arg7[%c0_84, %c0_85, %c0_86, %c0_87] : memref<4x8x16x128xf32, #tpu.memory_space<vmem>>, vector<4x8x16x128xf32>
    %267 = vector.shape_cast %80 : vector<16x128xf32> to vector<1x16x128xf32>
    %268 = vector.shape_cast %94 : vector<16x128xf32> to vector<1x16x128xf32>
    %269 = vector.shape_cast %108 : vector<16x128xf32> to vector<1x16x128xf32>
    %270 = vector.shape_cast %122 : vector<16x128xf32> to vector<1x16x128xf32>
    %271 = vector.shape_cast %136 : vector<16x128xf32> to vector<1x16x128xf32>
    %272 = vector.shape_cast %150 : vector<16x128xf32> to vector<1x16x128xf32>
    %273 = vector.shape_cast %164 : vector<16x128xf32> to vector<1x16x128xf32>
    %274 = vector.shape_cast %178 : vector<16x128xf32> to vector<1x16x128xf32>
    %275 = tpu.concatenate %267, %268, %269, %270, %271, %272, %273, %274 in 0 : vector<1x16x128xf32>, vector<1x16x128xf32>, vector<1x16x128xf32>, vector<1x16x128xf32>, vector<1x16x128xf32>, vector<1x16x128xf32>, vector<1x16x128xf32>, vector<1x16x128xf32> -> vector<8x16x128xf32>
    %276 = vector.shape_cast %275 : vector<8x16x128xf32> to vector<1x8x16x128xf32>
    %277 = vector.broadcast %276 : vector<1x8x16x128xf32> to vector<4x8x16x128xf32>
    %278 = arith.addf %266, %277 : vector<4x8x16x128xf32>
    %279 = vector.shape_cast %265 : vector<4x16x128xf32> to vector<4x1x16x128xf32>
    %280 = vector.broadcast %279 : vector<4x1x16x128xf32> to vector<4x8x16x128xf32>
    %281 = arith.mulf %278, %280 : vector<4x8x16x128xf32>
    %cst_88 = arith.constant dense<0.000000e+00> : vector<4x8x128xf32>
    %282 = vector.multi_reduction <add>, %281, %cst_88 [2] : vector<4x8x16x128xf32> to vector<4x8x128xf32>
    %c0_89 = arith.constant 0 : index
    %c0_90 = arith.constant 0 : index
    %c0_91 = arith.constant 0 : index
    %283 = vector.load %arg9[%c0_89, %c0_90, %c0_91] : memref<4x8x128xf32, #tpu.memory_space<vmem>>, vector<4x8x128xf32>
    tpu.vector_store %arg9[%c0_89, %c0_90, %c0_91], %282 {strides = array<i32>} : memref<4x8x128xf32, #tpu.memory_space<vmem>>, vector<4x8x128xf32>,
    return
  }
  func.func @transform_0(%arg0: i32) -> (i32, i32) {
    %c0_i32 = arith.constant 0 : i32
    %c0_i32_0 = arith.constant 0 : i32
    %c0_i32_1 = arith.constant 0 : i32
    return %c0_i32, %c0_i32_0 : i32, i32
  }
  func.func @transform_1(%arg0: i32) -> i32 {
    %c0_i32 = arith.constant 0 : i32
    %c0_i32_0 = arith.constant 0 : i32
    return %c0_i32 : i32
  }
  func.func @transform_2(%arg0: i32) -> (i32, i32) {
    %c0_i32 = arith.constant 0 : i32
    %c0_i32_0 = arith.constant 0 : i32
    %c0_i32_1 = arith.constant 0 : i32
    return %c0_i32, %c0_i32_0 : i32, i32
  }
  func.func @transform_3(%arg0: i32) -> i32 {
    %c0_i32 = arith.constant 0 : i32
    %c0_i32_0 = arith.constant 0 : i32
    return %c0_i32 : i32
  }
  func.func @transform_4(%arg0: i32) -> (i32, i32, i32) {
    %c0_i32 = arith.constant 0 : i32
    %c0_i32_0 = arith.constant 0 : i32
    %c0_i32_1 = arith.constant 0 : i32
    return %c0_i32, %c0_i32_0, %arg0 : i32, i32, i32
  }
  func.func @transform_5(%arg0: i32) -> (i32, i32, i32, i32) {
    %c0_i32 = arith.constant 0 : i32
    %c0_i32_0 = arith.constant 0 : i32
    %c0_i32_1 = arith.constant 0 : i32
    %c0_i32_2 = arith.constant 0 : i32
    return %c0_i32, %c0_i32_0, %c0_i32_1, %arg0 : i32, i32, i32, i32
  }
  func.func @transform_6(%arg0: i32) -> (i32, i32, i32, i32) {
    %c0_i32 = arith.constant 0 : i32
    %c0_i32_0 = arith.constant 0 : i32
    %c0_i32_1 = arith.constant 0 : i32
    %c0_i32_2 = arith.constant 0 : i32
    return %c0_i32, %c0_i32_0, %c0_i32_1, %arg0 : i32, i32, i32, i32
  }
  func.func @transform_7(%arg0: i32) -> (i32, i32, i32) {
    %c0_i32 = arith.constant 0 : i32
    %c0_i32_0 = arith.constant 0 : i32
    %c0_i32_1 = arith.constant 0 : i32
    return %c0_i32, %c0_i32_0, %arg0 : i32, i32, i32
  }
  func.func @transform_8(%arg0: i32) -> (i32, i32, i32) {
    %c0_i32 = arith.constant 0 : i32
    %c0_i32_0 = arith.constant 0 : i32
    %c0_i32_1 = arith.constant 0 : i32
    return %c0_i32, %c0_i32_0, %arg0 : i32, i32, i32
  }
}

</mosaic_0001>

<bundles_post_ra>
// kernel: tpu_custom_call.1
= control target key start
LH: loop header
LB: loop body
LE: loop exit
PB: predicated region body
PF: predicated region fallthrough
CT: control target
= control target key end

     0   :  { %s4016_s0 = inlined_call_operand.vmem [shape: f32[3,3], index: 0, kind: input, shape index: {}]   ;;  %s4017_s1 = inlined_call_operand.vmem [shape: f32[3], index: 1, kind: input, shape index: {}]   ;;  %s4018_s2 = inlined_call_operand.vmem [shape: f32[8,3], index: 2, kind: input, shape index: {}]   ;;  %s4019_s3 = inlined_call_operand.vmem [shape: f32[8], index: 3, kind: input, shape index: {}]   ;;  %s4020_s4 = inlined_call_operand.hbm [shape: f32[8,4,256], index: 4, kind: input, shape index: {}]   ;;  %s4021_s5 = inlined_call_operand.hbm [shape: f32[4,8,16,256], index: 5, kind: input, shape index: {}]   ;;  %s4022_s6 = inlined_call_operand.hbm [shape: f32[4,8,16,256], index: 6, kind: input, shape index: {}]   ;;  %s4023_s7 = inlined_call_operand.hbm [shape: f32[3,16,256], index: 7, kind: input, shape index: {}]   ;;  %s4024_s8 = inlined_call_operand.hbm [shape: f32[4,8,256], index: 8, kind: output, shape index: {}]  }
   0x1   :  { %4057 = sst [smem:[#allocation60_spill]] %s4016_s0 }
   0x2   :  { %4058 = sst [smem:[#allocation61_spill]] %s4017_s1 }
   0x3   :  { %4059 = sst [smem:[#allocation62_spill]] %s4021_s5 }
   0x4   :  { %13 = vsyncpa [#allocation5], 0 }
   0x5   :  { %14 = vsyncpa [#allocation7], 0 }
   0x6   :  { %15 = vsyncpa [#allocation10], 0 }
   0x7   :  { %16 = vsyncpa [#allocation3], 0 }
   0x8   :  { %18 = vsyncpa [#allocation3 + $0x1], 0 }
   0x9   :  { %19 = vsyncpa [#allocation13], 0 }
   0xa   :  { %21 = vsyncpa [#allocation13 + $0x1], 0 }
   0xb   :  { %22 = vsyncpa [#allocation16], 0 }
   0xc   :  { %24 = vsyncpa [#allocation16 + $0x1], 0 }
   0xd   :  { %25 = vsyncpa [#allocation4], 0 }
   0xe   :  { %27 = vsyncpa [#allocation4 + $0x1], 0  ;;  %s2622_s27 = smov 0   ;;  %s2624_s28 = smov 0  }
   0xf   :  { %s2626_s29 = smov 0   ;;  %s2628_s30 = smov 0  }
  0x10 LB: > { %4060 = sst [smem:[#allocation25_spill]] %s2545_s27  ;;  %s2643_s9 = sadd.s32 4294967295, %s2557_s30   ;;  %s2557_s30 = sphi %s2628_s30, %s4208_s30   ;;  %s2553_s29 = sphi %s2626_s29, %s4210_s29   ;;  %s2549_s28 = sphi %s2624_s28, %s4212_s28   ;;  %s2545_s27 = sphi %s2622_s27, %s4211_s27  }
  0x11   : > { %4061 = sst [smem:[#allocation26_spill]] %s2553_s29  ;;  %s2079_s10 = sadd.s32 4294967294, %s2557_s30  }
  0x12   : > { %s2647_s11 = sadd.s32 1, %s2557_s30   ;;  %s124_s12 = sadd.s32 1, %s2553_s29 }
  0x13   : > { %4062 = sst [smem:[#allocation27_spill]] %s2647_s11  ;;  %s121_s13 = ssub.s32 %s2557_s30, %s2647_s11 }
  0x14   : > { %p131_p0 = scmp.ne.s32.totalorder %s2553_s29, %s2549_s28  ;;  %p122_p1 = scmp.eq.s32.totalorder %s121_s13, 0 }
  0x15   : > { %p132_p2 = scmp.eq.s32.totalorder %s2557_s30, 0  ;;  %p137_p3 = scmp.ne.s32.totalorder %s2549_s28, %s2545_s27 }
  0x16   : > { %p4025_p4 = scmp.eq.s32.totalorder %s2643_s9, 0  ;;  %p239_p7 = scmp.eq.s32.totalorder %s2643_s9, 1 }
  0x17   : > { %s2659_s14 = scalar_select %p122_p1, %s2553_s29, %s124_s12  }
  0x18   : > { %p2661_p5 = por %p132_p2, %p131_p0  ;;  %p2667_p6 = por %p4025_p4, %p137_p3 }
  0x19   : > { %4063 = sst [smem:[#allocation28_spill]] %s2659_s14  ;;  %p245_p8 = scmp.eq.s32.totalorder %s2079_s10, 1 }
  0x1a   : > { %s4065_s16 = scalar_select %p2667_p6, 1, 0 }
  0x1b   : > { %p2080_p9 = scmp.ge.s32.totalorder %s2557_s30, 1  ;;  %p252_p10 = scmp.lt.s32.totalorder %s2557_s30, 3 }
  0x1c   : > { %p2674_p11 = por %p239_p7, %p131_p0  ;;  %p2678_p12 = por %p245_p8, %p137_p3 }
  0x1d   : > { %p2682_p13 = pnand %p2080_p9, %p252_p10  ;;  %s4070_s1 = sld [smem:[#allocation61_spill]] }
  0x1e   : > { %s4066_s17 = scalar_select %p2674_p11, 1, 0 }
  0x1f   : > { %s4067_s18 = scalar_select %p2678_p12, 1, 0 }
  0x20   : > { %s4069_s19 = scalar_select %p2682_p13, 1, 0 }
  0x21   : > { %4068 = sst [smem:[#allocation29_spill]] %s4067_s18  ;;  %p2182_p1 = pneg %p2682_p13 }
  0x22   : > { %p2216_p2 = scmp.lt.s32.totalorder %s2557_s30, 2  ;;  %s2700_s24 = sand.u32 1, %s2553_s29  }
  0x23   : > { %s276_s22 = sshll.u32 %s4070_s1, 4  ;;  %p2695_p7 = pnand %p2182_p1, %p4025_p4  ;;  %s277_s22 = int_to_ptr.vmem [resolvable:$true] %s276_s22 }
  0x24   : > { %p2704_p3 = pnand %p2216_p2, %p2661_p5  ;;  %s329_s26 = sand.u32 1, %s2557_s30  }
  0x25   : > { %s4071_s23 = scalar_select %p2695_p7, 1, 0 }
  0x26   : > { %s4072_s25 = scalar_select %p2704_p3, 1, 0 }
  0x27   : > { %s2291_s10 = scalar_lea.vmem %s277_s22, 16  ;;  %p4031_p9 = pneg %p2695_p7 }
  0x28   : > { %p2292_p8 = scmp.ne.s32.totalorder %s277_s22, %s2291_s10  ;;  %p2299_p0 = scmp.lt.s32.totalorder %s277_s22, %s277_s22 }
  0x29   : > { %p2300_p4 = scmp.lt.s32.totalorder %s2291_s10, %s2291_s10 }
  0x2a   : > { %p2294_p10 = pnand %p4031_p9, %p2292_p8 }
  0x2b   : > { %p2301_p12 = por %p2300_p4, %p2299_p0 }
  0x2c   : > { %p2295_p1 = pneg %p2294_p10 }
  0x2e   : > { %p2302_p11 = pnand %p2301_p12, %p2295_p1 }
  0x30   : > { %2305 = shalt.err (!%p2302_p11)
}
  0x31   : > { %s2559_s12 = smov [#allocation6]   ;;  %s4028_s13 = sshll.u32 %s2700_s24, 9 }
  0x32   : > { %2188 = dma.vmem_to_smem (!%p2695_p7), %s277_s22, 16, %s2559_s12, [#allocation7]  }
  0x33   : > { %s2718_s15 = sshll.u32 %s2557_s30, 7  ;;  %s4073_s5 = sld [smem:[#allocation62_spill]] }
  0x34   : > { %s333_s10 = scalar_lea.vmem [#allocation12], %s4028_s13  ;;  %s2730_s29 = scalar_lea.sflag [#allocation13], %s329_s26 }
  0x35   : > { %s339_s14 = sshll.u32 %s333_s10, 4  ;;  %p2736_p5 = pneg %p2704_p3  ;;  %s2728_s14 = int_to_ptr.vmem [resolvable:$true] %s339_s14 }
  0x37   : > { %s4074_s12 = scalar_select %p2736_p5, 1, 0 }
  0x39   : > { %s2724_s1 = scalar_lea.hbm %s4073_s5, %s2718_s15  ;;  %s2311_s13 = scalar_lea.hbm %s4073_s5, 16384 }
  0x3a   : > { %s2306_s22 = scalar_lea.hbm %s2724_s1, 8192  ;;  %p2312_p0 = scmp.lt.u32.totalorder %s2724_s1, %s4073_s5 }
  0x3b   : > { %p2307_p4 = scmp.ne.s32.totalorder %s2724_s1, %s2306_s22  ;;  %p2313_p2 = scmp.lt.u32.totalorder %s2311_s13, %s2306_s22 }
  0x3c   : > { %p2315_p10 = scmp.lt.u32.totalorder %s2306_s22, %s2724_s1 }
  0x3d   : > { %p2309_p11 = pnand %p2736_p5, %p2307_p4  ;;  %p2314_p8 = por %p2313_p2, %p2312_p0 }
  0x3f   : > { %p2310_p12 = pneg %p2309_p11  ;;  %p2316_p1 = por %p2315_p10, %p2314_p8 }
  0x41   : > { %p2317_p9 = pnand %p2316_p1, %p2310_p12 }
  0x43   : > { %2320 = shalt.err (!%p2317_p9)
}
  0x44   : > { %s2321_s26 = scalar_lea.vmem %s2728_s14, 8192  ;;  %s2560_s20 = smov [#allocation12]  }
  0x45   : > { %p2322_p4 = scmp.ne.s32.totalorder %s2728_s14, %s2321_s26  ;;  %s2326_s21 = sshll.u32 %s2560_s20, 4  ;;  %s2327_s21 = int_to_ptr.vmem [resolvable:$false] %s2326_s21 }
  0x46   : > { %s2328_s11 = scalar_lea.vmem %s2327_s21, 16384  ;;  %p2329_p13 = scmp.lt.s32.totalorder %s2728_s14, %s2327_s21 }
  0x47   : > { %p2324_p11 = pnand %p2322_p4, %p2736_p5  ;;  %p2330_p7 = scmp.lt.s32.totalorder %s2328_s11, %s2321_s26 }
  0x49   : > { %p2325_p6 = pneg %p2324_p11  ;;  %p2331_p0 = por %p2330_p7, %p2329_p13 }
  0x4b   : > { %p2332_p2 = pnand %p2331_p0, %p2325_p6 }
  0x4d   : > { %2335 = shalt.err (!%p2332_p2)
}
  0x4e   : > { %s4038_s13 = smov 256   ;;  %s4046_s22 = smov 128  }
  0x4f   : > { %s4040_s10 = smov 8   ;;  %s4075_s0 = sld [smem:[#allocation60_spill]] }
  0x50   : > { %2201 = dma.hbm_to_vmem [thread:$0]  (!%p2704_p3), %s2724_s1, 8192, %s2728_s14, %s2730_s29, %s4038_s13, %s4046_s22, %s4040_s10  }
  0x51   : > { %s4076_s11 = sshll.u32 %s2700_s24, 9  ;;  %p4077_p13 = scmp.ne.s32.totalorder %s4071_s23, 0 }
  0x52   : > { %s353_s5 = scalar_lea.vmem [#allocation14], %s4076_s11 }
  0x53   : > { %s359_s18 = sshll.u32 %s353_s5, 4  ;;  %p4078_p7 = pneg %p4077_p13  ;;  %s2768_s18 = int_to_ptr.vmem [resolvable:$true] %s359_s18 }
  0x55   : > { %s265_s26 = sshll.u32 %s4075_s0, 4  ;;  %s266_s26 = int_to_ptr.vmem [resolvable:$true] %s265_s26 }
  0x56   : > { %s2336_s27 = scalar_lea.vmem %s266_s26, 64  ;;  %p2344_p8 = scmp.lt.s32.totalorder %s266_s26, %s266_s26 }
  0x57   : > { %p2337_p6 = scmp.ne.s32.totalorder %s266_s26, %s2336_s27  ;;  %p2345_p10 = scmp.lt.s32.totalorder %s2336_s27, %s2336_s27 }
  0x59   : > { %p2339_p9 = pnand %p2337_p6, %p4078_p7  ;;  %p2346_p1 = por %p2345_p10, %p2344_p8 }
  0x5b   : > { %p2340_p12 = pneg %p2339_p9 }
  0x5d   : > { %p2347_p4 = pnand %p2346_p1, %p2340_p12 }
  0x5f   : > { %2350 = shalt.err (!%p2347_p4)
}
  0x60   : > { %s2564_s1 = smov [#allocation2]   ;;  %s287_s20 = sshll.u32 %s4018_s2, 4  ;;  %s288_s20 = int_to_ptr.vmem [resolvable:$true] %s287_s20 }
  0x61   : > { %2185 = dma.vmem_to_smem (!%p4077_p13), %s266_s26, 64, %s2564_s1, [#allocation5]  }
  0x62   : > { %s298_s13 = sshll.u32 %s4019_s3, 4  ;;  %s2351_s10 = scalar_lea.vmem %s288_s20, 128  ;;  %s299_s13 = int_to_ptr.vmem [resolvable:$true] %s298_s13 }
  0x63   : > { %p2352_p11 = scmp.ne.s32.totalorder %s288_s20, %s2351_s10  ;;  %p4079_p0 = pmov %p4078_p7 }
  0x64   : > { %p2359_p7 = scmp.lt.s32.totalorder %s288_s20, %s288_s20  ;;  %p2360_p9 = scmp.lt.s32.totalorder %s2351_s10, %s2351_s10 }
  0x65   : > { %p2354_p2 = pnand %p2352_p11, %p4079_p0 }
  0x66   : > { %p2361_p12 = por %p2360_p9, %p2359_p7 }
  0x67   : > { %p2355_p6 = pneg %p2354_p2 }
  0x69   : > { %p2362_p8 = pnand %p2361_p12, %p2355_p6 }
  0x6b   : > { %2365 = shalt.err (!%p2362_p8)
}
  0x6c   : > { %s2565_s27 = smov [#allocation8]   ;;  %s2366_s26 = scalar_lea.vmem %s299_s13, 16 }
  0x6d   : > { %2191 = dma.vmem_to_smem (!%p4077_p13), %s288_s20, 128, %s2565_s27, [#allocation7]  }
  0x6e   : > { %p2367_p10 = scmp.ne.s32.totalorder %s299_s13, %s2366_s26  ;;  %p4080_p1 = pmov %p4079_p0 }
  0x6f   : > { %p2374_p5 = scmp.lt.s32.totalorder %s299_s13, %s299_s13  ;;  %p2375_p11 = scmp.lt.s32.totalorder %s2366_s26, %s2366_s26 }
  0x70   : > { %p2369_p4 = pnand %p2367_p10, %p4080_p1 }
  0x71   : > { %p2376_p0 = por %p2375_p11, %p2374_p5 }
  0x72   : > { %p2370_p3 = pneg %p2369_p4 }
  0x74   : > { %p2377_p2 = pnand %p2376_p0, %p2370_p3 }
  0x76   : > { %2380 = shalt.err (!%p2377_p2)
}
  0x77   : > { %s2566_s10 = smov [#allocation9]   ;;  %s2086_s1 = sshll.u32 %s2700_s24, 5 }
  0x78   : > { %2194 = dma.vmem_to_smem (!%p4077_p13), %s299_s13, 16, %s2566_s10, [#allocation10]  }
  0x79   : > { %s2087_s5 = sshll.u32 %s2557_s30, 6  ;;  %s313_s11 = scalar_lea.vmem [#allocation11], %s2086_s1 }
  0x7a   : > { %s2796_s21 = scalar_lea.hbm %s4020_s4, %s2087_s5  ;;  %s319_s27 = sshll.u32 %s313_s11, 4  ;;  %s2798_s27 = int_to_ptr.vmem [resolvable:$true] %s319_s27 }
  0x7b   : > { %s2804_s22 = scalar_lea.hbm %s4022_s6, %s2718_s15  ;;  %s310_s13 = scalar_lea.sflag [#allocation3], %s2700_s24 }
  0x7c   : > { %s2381_s10 = scalar_lea.hbm %s2796_s21, 512  ;;  %p4081_p5 = scmp.ne.s32.totalorder %s4074_s12, 0 }
  0x7d   : > { %p2382_p3 = scmp.ne.s32.totalorder %s2796_s21, %s2381_s10  ;;  %s2386_s20 = scalar_lea.hbm %s4020_s4, 1024 }
  0x7e   : > { %p2387_p7 = scmp.lt.u32.totalorder %s2796_s21, %s4020_s4  ;;  %p2388_p9 = scmp.lt.u32.totalorder %s2386_s20, %s2381_s10 }
  0x7f   : > { %p2384_p13 = pnand %p2382_p3, %p4081_p5  ;;  %p2390_p8 = scmp.lt.u32.totalorder %s2381_s10, %s2796_s21 }
  0x80   : > { %p2389_p12 = por %p2388_p9, %p2387_p7 }
  0x81   : > { %p2385_p6 = pneg %p2384_p13 }
  0x82   : > { %p2391_p10 = por %p2390_p8, %p2389_p12 }
  0x84   : > { %p2392_p1 = pnand %p2391_p10, %p2385_p6 }
  0x86   : > { %2395 = shalt.err (!%p2392_p1)
}
  0x87   : > { %s2396_s11 = scalar_lea.vmem %s2798_s27, 512  ;;  %s2567_s23 = smov [#allocation11]  }
  0x88   : > { %p2397_p4 = scmp.ne.s32.totalorder %s2798_s27, %s2396_s11  ;;  %s2401_s26 = sshll.u32 %s2567_s23, 4  ;;  %s2402_s26 = int_to_ptr.vmem [resolvable:$false] %s2401_s26 }
  0x89   : > { %s2403_s0 = scalar_lea.vmem %s2402_s26, 1024  ;;  %p2404_p2 = scmp.lt.s32.totalorder %s2798_s27, %s2402_s26 }
  0x8a   : > { %p2399_p11 = pnand %p2397_p4, %p4081_p5  ;;  %p2405_p3 = scmp.lt.s32.totalorder %s2403_s0, %s2396_s11 }
  0x8c   : > { %p2400_p0 = pneg %p2399_p11  ;;  %p2406_p13 = por %p2405_p3, %p2404_p2 }
  0x8e   : > { %p2407_p7 = pnand %p2406_p13, %p2400_p0 }
  0x90   : > { %2410 = shalt.err (!%p2407_p7)
}
  0x91   : > { %s2568_s10 = smov 64   ;;  %s2569_s5 = smov 4  }
  0x92   : > { %p4082_p6 = scmp.ne.s32.totalorder %s4072_s25, 0  ;;  %s4083_s14 = smov 128  }
  0x93   : > { %s2411_s20 = scalar_lea.hbm %s2804_s22, 8192  ;;  %s2416_s23 = scalar_lea.hbm %s4022_s6, 16384 }
  0x94   : > { %2198 = dma.hbm_to_vmem [thread:$0]  (!%p4082_p6), %s2796_s21, 512, %s2798_s27, %s310_s13, %s4083_s14, %s2568_s10, %s2569_s5  }
  0x95   : > { %p2412_p9 = scmp.ne.s32.totalorder %s2804_s22, %s2411_s20  ;;  %p2417_p10 = scmp.lt.u32.totalorder %s2804_s22, %s4022_s6 }
  0x96   : > { %p2418_p1 = scmp.lt.u32.totalorder %s2416_s23, %s2411_s20  ;;  %p2420_p11 = scmp.lt.u32.totalorder %s2411_s20, %s2804_s22 }
  0x97   : > { %p2414_p12 = pnand %p2412_p9, %p4081_p5 }
  0x98   : > { %p2419_p4 = por %p2418_p1, %p2417_p10 }
  0x99   : > { %p2415_p8 = pneg %p2414_p12 }
  0x9a   : > { %p2421_p0 = por %p2420_p11, %p2419_p4 }
  0x9c   : > { %p2422_p2 = pnand %p2421_p0, %p2415_p8 }
  0x9e   : > { %2425 = shalt.err (!%p2422_p2)
}
  0x9f   : > { %s2426_s21 = scalar_lea.vmem %s2768_s18, 8192  ;;  %s2570_s27 = smov [#allocation14]  }
  0xa0   : > { %p2427_p3 = scmp.ne.s32.totalorder %s2768_s18, %s2426_s21  ;;  %s2431_s13 = sshll.u32 %s2570_s27, 4  ;;  %s2432_s13 = int_to_ptr.vmem [resolvable:$false] %s2431_s13 }
  0xa1   : > { %s2433_s10 = scalar_lea.vmem %s2432_s13, 16384  ;;  %p2434_p9 = scmp.lt.s32.totalorder %s2768_s18, %s2432_s13 }
  0xa2   : > { %p2429_p13 = pnand %p2427_p3, %p4081_p5  ;;  %p2435_p12 = scmp.lt.s32.totalorder %s2433_s10, %s2426_s21 }
  0xa4   : > { %p2430_p7 = pneg %p2429_p13  ;;  %p2436_p10 = por %p2435_p12, %p2434_p9 }
  0xa6   : > { %p2437_p1 = pnand %p2436_p10, %p2430_p7 }
  0xa8   : > { %2440 = shalt.err (!%p2437_p1)
}
  0xa9   : > { %s4084_s5 = smov 8   ;;  %s4085_s20 = smov 256  }
  0xaa   : > { %2204 = dma.hbm_to_vmem [thread:$0]  (!%p4082_p6), %s2804_s22, 8192, %s2768_s18, %s2730_s29, %s4085_s20, %s4083_s14, %s4084_s5  }
  0xab   : > { %s2154_s1 = smul.u32 48, %s2700_s24  ;;  %s2861_s26 = scalar_lea.hbm %s4023_s7, %s2718_s15 }
  0xac   : > { %s370_s27 = scalar_lea.sflag [#allocation16], %s2700_s24  ;;  %s2441_s13 = scalar_lea.hbm %s2861_s26, 768 }
  0xad   : > { %s373_s0 = scalar_lea.vmem [#allocation15], %s2154_s1  ;;  %p2442_p8 = scmp.ne.s32.totalorder %s2861_s26, %s2441_s13 }
  0xae   : > { %s379_s21 = sshll.u32 %s373_s0, 4  ;;  %s2446_s22 = scalar_lea.hbm %s4023_s7, 1536  ;;  %s2863_s21 = int_to_ptr.vmem [resolvable:$true] %s379_s21 }
  0xaf   : > { %p2444_p4 = pnand %p2442_p8, %p4081_p5  ;;  %p2447_p0 = scmp.lt.u32.totalorder %s2861_s26, %s4023_s7 }
  0xb0   : > { %p2448_p2 = scmp.lt.u32.totalorder %s2446_s22, %s2441_s13  ;;  %p2450_p13 = scmp.lt.u32.totalorder %s2441_s13, %s2861_s26 }
  0xb1   : > { %p2445_p11 = pneg %p2444_p4 }
  0xb2   : > { %p2449_p3 = por %p2448_p2, %p2447_p0 }
  0xb4   : > { %p2451_p7 = por %p2450_p13, %p2449_p3 }
  0xb6   : > { %p2452_p9 = pnand %p2451_p7, %p2445_p11 }
  0xb8   : > { %2455 = shalt.err (!%p2452_p9)
}
  0xb9   : > { %s2456_s1 = scalar_lea.vmem %s2863_s21, 768  ;;  %s2571_s11 = smov [#allocation15]  }
  0xba   : > { %p2457_p12 = scmp.ne.s32.totalorder %s2863_s21, %s2456_s1  ;;  %s2461_s23 = sshll.u32 %s2571_s11, 4  ;;  %s2462_s23 = int_to_ptr.vmem [resolvable:$false] %s2461_s23 }
  0xbb   : > { %s2463_s0 = scalar_lea.vmem %s2462_s23, 1536  ;;  %p2464_p8 = scmp.lt.s32.totalorder %s2863_s21, %s2462_s23 }
  0xbc   : > { %p2459_p10 = pnand %p2457_p12, %p4081_p5  ;;  %p2465_p4 = scmp.lt.s32.totalorder %s2463_s0, %s2456_s1 }
  0xbe   : > { %p2460_p1 = pneg %p2459_p10  ;;  %p2466_p0 = por %p2465_p4, %p2464_p8 }
  0xc0   : > { %p2467_p2 = pnand %p2466_p0, %p2460_p1 }
  0xc2   : > { %2470 = shalt.err (!%p2467_p2)
}
  0xc3   : > { %2207 = dma.hbm_to_vmem [thread:$0]  (!%p4082_p6), %s2861_s26, 768, %s2863_s21, %s370_s27, %s4085_s20, %s4083_s14, %s4084_s5  }
  0xc4   : > { %p4086_p5 = scmp.ne.s32.totalorder %s4069_s19, 0 }
  0xc6   : > { %391 = sbr.rel (%p4086_p5) target bundleno = 496 (0x1f0), region = 52 }
  0xcd   : > { %p4087_p11 = scmp.eq.s32.totalorder %s2643_s9, 0 }
  0xcf   : > { %2516 = dma.done.wait (%p4087_p11), [#allocation5], 64   ;;  %p4088_p3 = pmov %p4087_p11 }
  0xd1   : > { %2518 = vsyncadd (%p4088_p3), [#allocation5], 4294967232  ;;  %p4089_p13 = pmov %p4088_p3 }
  0xd2   : > { %p4090_p7 = pmov %p4088_p3 }
  0xd3   : > { %2520 = dma.done.wait (%p4089_p13), [#allocation7], 144  }
  0xd4   : > { %2522 = vsyncadd (%p4090_p7), [#allocation7], 4294967152  ;;  %p4091_p9 = pmov %p4088_p3 }
  0xd5   : > { %p4092_p6 = pmov %p4088_p3 }
  0xd6   : > { %2524 = dma.done.wait (%p4091_p9), [#allocation10], 16  }
  0xd7   : > { %2526 = vsyncadd (%p4092_p6), [#allocation10], 4294967280  ;;  %s2907_s19 = sand.u32 1, %s2549_s28   ;;  %p4093_p12 = scmp.ne.s32.totalorder %s4065_s16, 0 }
  0xd8   : > { %s2098_s24 = sshll.u32 %s2907_s19, 5  ;;  %s410_s25 = scalar_lea.sflag [#allocation3], %s2907_s19 }
  0xd9   : > { %s2913_s12 = scalar_lea.vmem [#allocation11], %s2098_s24 }
  0xda   : > { %2528 = dma.done.wait (%p4093_p12), %s410_s25, 512  }
  0xdb   : > { %2530 = vsyncadd (%p4093_p12), %s410_s25, 4294966784  ;;  %s418_s14 = sand.u32 1, %s2643_s9   ;;  %s2099_s5 = sshll.u32 %s2907_s19, 9 }
  0xdc   : > { %s419_s20 = scalar_lea.sflag [#allocation13], %s418_s14  ;;  %s2921_s26 = scalar_lea.vmem [#allocation12], %s2099_s5 }
  0xdd   : > { %2532 = dma.done.wait (%p4093_p12), %s419_s20, 16384  }
  0xde   : > { %2534 = vsyncadd (%p4093_p12), %s419_s20, 4294950912  ;;  %s2155_s21 = smul.u32 48, %s2907_s19  ;;  %s2928_s27 = scalar_lea.vmem [#allocation14], %s2099_s5 }
  0xdf   : > { %s437_s13 = scalar_lea.sflag [#allocation16], %s2907_s19 }
  0xe0   : > { %s440_s29 = scalar_lea.vmem [#allocation15], %s2155_s21 }
  0xe1   : > { %2536 = dma.done.wait (%p4093_p12), %s437_s13, 768  }
  0xe2   : > { %2538 = vsyncadd (%p4093_p12), %s437_s13, 4294966528 }
  0xe3   : > { %445 = sfence }
  0xe4   : > { %s495_s18 = sld [smem:[#allocation2]]  ;;  %s2102_s22 = sld [smem:[#allocation2 + $0x1]]  ;;  %v489_v0 = vld [vmem:[%s440_s29] sm:$0xff]  ;;  %v490_v1 = vld [vmem:[%s440_s29 + $0x8] sm:$0xff]  ;;  %v491_v2 = vld [vmem:[%s440_s29 + $0x10] sm:$0xff]  ;;  %vm1843_vm0 = vcmask 1041409  }
  0xe5   : > { %s2103_s15 = sld [smem:[#allocation2 + $0x2]]  ;;  %s2935_s10 = sld [smem:[#allocation6]]  ;;  %v492_v3 = vld [vmem:[%s440_s29 + $0x18] sm:$0xff]  ;;  %v493_v4 = vld [vmem:[%s440_s29 + $0x20] sm:$0xff]  ;;  %v494_v5 = vld [vmem:[%s440_s29 + $0x28] sm:$0xff]  ;;  %vm1845_vm1 = vcmask 1042434  }
  0xe6   : > { %s2104_s1 = sld [smem:[#allocation2 + $0x80]]  ;;  %s2937_s11 = sld [smem:[#allocation2 + $0x81]]  ;;  %vm1847_vm2 = vcmask 1043459   ;;  %vm1849_vm3 = vcmask 1044484   ;;  %vm1851_vm4 = vcmask 1045509   ;;  %vm1853_vm5 = vcmask 1046534  }
  0xe7   : > { %s2939_s23 = sld [smem:[#allocation2 + $0x82]]  ;;  %s2941_s0 = sld [smem:[#allocation6 + $0x1]]  ;;  %vm1855_vm6 = vcmask 1047559  }
  0xe8   : > { %s2943_s16 = sld [smem:[#allocation2 + $0x100]]  ;;  %s2945_s25 = sld [smem:[#allocation2 + $0x101]] }
  0xe9   : > { %s2948_s14 = sld [smem:[#allocation2 + $0x102]]  ;;  %s2951_s5 = sld [smem:[#allocation8]] }
  0xea   : > { %v496_v6 = vstv %s495_s18  ;;  %v500_v9 = vstv %s2102_s22  ;;  %s2953_s20 = sld [smem:[#allocation8 + $0x1]]  ;;  %s2957_s21 = sld [smem:[#allocation6 + $0x2]] }
  0xeb   : > { %v497_v7 = vmul.f32 %v496_v6, %v489_v0  ;;  %v498_v8 = vmul.f32 %v496_v6, %v490_v1  ;;  %v501_v10 = vmul.f32 %v500_v9, %v491_v2  ;;  %v502_v11 = vmul.f32 %v500_v9, %v492_v3  ;;  %s2961_s13 = sld [smem:[#allocation8 + $0x80]]  ;;  %s2963_s29 = sld [smem:[#allocation8 + $0x81]] }
  0xec   : > { %v506_v12 = vstv %s2103_s15  ;;  %v512_v13 = vstv %s2935_s10  ;;  %v518_v16 = vstv %s2104_s1  ;;  %v522_v17 = vstv %s2937_s11  ;;  %s2965_s18 = sld [smem:[#allocation8 + $0x2]]  ;;  %s2972_s22 = sld [smem:[#allocation8 + $0x100]] }
  0xed   : > { %v507_v14 = vmul.f32 %v506_v12, %v493_v4  ;;  %v508_v15 = vmul.f32 %v506_v12, %v494_v5  ;;  %v503_v18 = vadd.f32 %v501_v10, %v497_v7  ;;  %v504_v19 = vadd.f32 %v502_v11, %v498_v8  ;;  %s2974_s15 = sld [smem:[#allocation8 + $0x101]]  ;;  %s2978_s10 = sld [smem:[#allocation8 + $0x82]] }
  0xee   : > { %v519_v20 = vmul.f32 %v518_v16, %v489_v0  ;;  %v520_v21 = vmul.f32 %v518_v16, %v490_v1  ;;  %v523_v22 = vmul.f32 %v522_v17, %v491_v2  ;;  %v524_v23 = vmul.f32 %v522_v17, %v492_v3  ;;  %s2985_s1 = sld [smem:[#allocation9]]  ;;  %s2987_s11 = sld [smem:[#allocation9 + $0x1]] }
  0xef   : > { %v528_v24 = vstv %s2939_s23  ;;  %v534_v25 = vstv %s2941_s0  ;;  %v509_v26 = vadd.f32 %v507_v14, %v503_v18  ;;  %v510_v27 = vadd.f32 %v508_v15, %v504_v19  ;;  %s2993_s23 = sld [smem:[#allocation8 + $0x102]]  ;;  %s2999_s0 = sld [smem:[#allocation8 + $0x180]] }
  0xf0   : > { %v529_v28 = vmul.f32 %v528_v24, %v493_v4  ;;  %v530_v29 = vmul.f32 %v528_v24, %v494_v5  ;;  %v525_v30 = vadd.f32 %v523_v22, %v519_v20  ;;  %v526_v31 = vadd.f32 %v524_v23, %v520_v21  ;;  %p4203_p1 = scmp.ne.s32.totalorder %s4066_s17, 0 }
  0xf1   : > { %v540_v32 = vstv %s2943_s16  ;;  %v544_v33 = vstv %s2945_s25  ;;  %v513_v34 = vadd.f32 %v512_v13, %v509_v26  ;;  %v514_v35 = vadd.f32 %v512_v13, %v510_v27  ;;  %s3001_s16 = sld [smem:[#allocation8 + $0x181]]  ;;  %s3012_s25 = sld [smem:[#allocation9 + $0x2]] }
  0xf2   : > { %v541_v36 = vmul.f32 %v540_v32, %v489_v0  ;;  %v542_v37 = vmul.f32 %v540_v32, %v490_v1  ;;  %v531_v38 = vadd.f32 %v529_v28, %v525_v30  ;;  %v532_v39 = vadd.f32 %v530_v29, %v526_v31 }
  0xf3   : > { %v545_v40 = vmul.f32 %v544_v33, %v491_v2  ;;  %v546_v41 = vmul.f32 %v544_v33, %v492_v3  ;;  %v2967_v42 = vmax.f32 %v513_v34, 0.0  ;;  %v2969_v43 = vmax.f32 %v514_v35, 0.0 }
  0xf4   : > { %v550_v44 = vstv %s2948_s14  ;;  %v535_v45 = vadd.f32 %v534_v25, %v531_v38  ;;  %v536_v46 = vadd.f32 %v534_v25, %v532_v39  ;;  %v562_v51 = vstv %s2951_s5  ;;  %s3014_s14 = sld [smem:[#allocation8 + $0x182]]  ;;  %s3023_s5 = sld [smem:[#allocation8 + $0x200]] }
  0xf5   : > { %v547_v47 = vadd.f32 %v545_v40, %v541_v36  ;;  %v548_v48 = vadd.f32 %v546_v41, %v542_v37  ;;  %v551_v49 = vmul.f32 %v550_v44, %v493_v4  ;;  %v552_v50 = vmul.f32 %v550_v44, %v494_v5 }
  0xf6   : > { %v566_v52 = vstv %s2953_s20  ;;  %v2980_v53 = vmax.f32 %v535_v45, 0.0  ;;  %v2982_v54 = vmax.f32 %v536_v46, 0.0  ;;  %v556_v55 = vstv %s2957_s21  ;;  %s3025_s20 = sld [smem:[#allocation8 + $0x201]]  ;;  %s3032_s21 = sld [smem:[#allocation8 + $0x202]] }
  0xf7   : > { %v553_v56 = vadd.f32 %v551_v49, %v547_v47  ;;  %v554_v57 = vadd.f32 %v552_v50, %v548_v48  ;;  %v563_v58 = vmul.f32 %v562_v51, %v2967_v42  ;;  %v582_v60 = vstv %s2961_s13  ;;  %s3034_s13 = sld [smem:[#allocation9 + $0x3]] }
  0xf8   : > { %v567_v59 = vmul.f32 %v566_v52, %v2980_v53  ;;  %v586_v61 = vstv %s2963_s29  ;;  %v564_v0 = vmul.f32 %v562_v51, %v2969_v43  ;;  %v568_v1 = vmul.f32 %v566_v52, %v2982_v54  ;;  %s3040_s29 = sld [smem:[#allocation8 + $0x280]] }
  0xf9   : > { %v557_v62 = vadd.f32 %v556_v55, %v553_v56  ;;  %v558_v63 = vadd.f32 %v556_v55, %v554_v57  ;;  %v572_v2 = vstv %s2965_s18  ;;  %v583_v3 = vmul.f32 %v582_v60, %v2967_v42  ;;  %s3042_s18 = sld [smem:[#allocation8 + $0x281]] }
  0xfa   : > { %v584_v6 = vmul.f32 %v582_v60, %v2969_v43  ;;  %v587_v7 = vmul.f32 %v586_v61, %v2980_v53  ;;  %v569_v8 = vadd.f32 %v567_v59, %v563_v58  ;;  %v588_v9 = vmul.f32 %v586_v61, %v2982_v54 }
  0xfb   : > { %v3003_v4 = vmax.f32 %v557_v62, 0.0  ;;  %v3005_v5 = vmax.f32 %v558_v63, 0.0  ;;  %v602_v10 = vstv %s2972_s22  ;;  %v606_v11 = vstv %s2974_s15  ;;  %s3050_s22 = sld [smem:[#allocation9 + $0x4]]  ;;  %s3054_s15 = sld [smem:[#allocation8 + $0x282]] }
  0xfc   : > { %v570_v12 = vadd.f32 %v568_v1, %v564_v0  ;;  %v592_v15 = vstv %s2978_s10  ;;  %v603_v16 = vmul.f32 %v602_v10, %v2967_v42  ;;  %v604_v17 = vmul.f32 %v602_v10, %v2969_v43  ;;  %s3062_s10 = sld [smem:[#allocation8 + $0x300]] }
  0xfd   : > { %v573_v13 = vmul.f32 %v572_v2, %v3003_v4  ;;  %v574_v14 = vmul.f32 %v572_v2, %v3005_v5  ;;  %v607_v18 = vmul.f32 %v606_v11, %v2980_v53  ;;  %v608_v19 = vmul.f32 %v606_v11, %v2982_v54 }
  0xfe   : > { %v578_v20 = vstv %s2985_s1  ;;  %v589_v21 = vadd.f32 %v587_v7, %v583_v3  ;;  %v598_v22 = vstv %s2987_s11  ;;  %v819_v23 = vlaneseq  ;;  %s3064_s1 = sld [smem:[#allocation8 + $0x301]]  ;;  %s3068_s11 = sld [smem:[#allocation9 + $0x5]] }
  0xff   : > { %v590_v24 = vadd.f32 %v588_v9, %v584_v6  ;;  %v593_v25 = vmul.f32 %v592_v15, %v3003_v4  ;;  %v594_v26 = vmul.f32 %v592_v15, %v3005_v5  ;;  %v612_v27 = vstv %s2993_s23  ;;  %s3073_s23 = sld [smem:[#allocation8 + $0x302]] }
 0x100   : > { %v575_v28 = vadd.f32 %v573_v13, %v569_v8  ;;  %v576_v29 = vadd.f32 %v574_v14, %v570_v12  ;;  %v609_v30 = vadd.f32 %v607_v18, %v603_v16  ;;  %v610_v31 = vadd.f32 %v608_v19, %v604_v17 }
 0x101   : > { %v613_v32 = vmul.f32 %v612_v27, %v3003_v4  ;;  %v614_v33 = vmul.f32 %v612_v27, %v3005_v5  ;;  %v622_v34 = vstv %s2999_s0  ;;  %v626_v35 = vstv %s3001_s16  ;;  %s3080_s0 = sld [smem:[#allocation8 + $0x380]]  ;;  %s3082_s16 = sld [smem:[#allocation8 + $0x381]] }
 0x102   : > { %v623_v36 = vmul.f32 %v622_v34, %v2967_v42  ;;  %v624_v37 = vmul.f32 %v622_v34, %v2969_v43  ;;  %v627_v38 = vmul.f32 %v626_v35, %v2980_v53  ;;  %v628_v39 = vmul.f32 %v626_v35, %v2982_v54 }
 0x103   : > { %v595_v40 = vadd.f32 %v593_v25, %v589_v21  ;;  %v596_v41 = vadd.f32 %v594_v26, %v590_v24  ;;  %v618_v44 = vstv %s3012_s25  ;;  %v632_v45 = vstv %s3014_s14  ;;  %s3097_s25 = sld [smem:[#allocation8 + $0x382]]  ;;  %s3106_s14 = sld [smem:[#allocation9 + $0x6]] }
 0x104   : > { %v629_v46 = vadd.f32 %v627_v38, %v623_v36  ;;  %v630_v47 = vadd.f32 %v628_v39, %v624_v37  ;;  %v633_v48 = vmul.f32 %v632_v45, %v3003_v4  ;;  %v634_v49 = vmul.f32 %v632_v45, %v3005_v5 }
 0x105   : > { %v3056_v50 = vadd.f32 %v578_v20, %v575_v28  ;;  %v3058_v51 = vadd.f32 %v578_v20, %v576_v29  ;;  %v642_v52 = vstv %s3023_s5  ;;  %v646_v55 = vstv %s3025_s20  ;;  %s3118_s5 = sld [smem:[#allocation9 + $0x7]] }
 0x106   : > { %v615_v56 = vadd.f32 %v613_v32, %v609_v30  ;;  %v616_v57 = vadd.f32 %v614_v33, %v610_v31  ;;  %v643_v58 = vmul.f32 %v642_v52, %v2967_v42  ;;  %v644_v59 = vmul.f32 %v642_v52, %v2969_v43 }
 0x107   : > { %v635_v60 = vadd.f32 %v633_v48, %v629_v46  ;;  %v647_v61 = vmul.f32 %v646_v55, %v2980_v53  ;;  %v648_v62 = vmul.f32 %v646_v55, %v2982_v54  ;;  %v652_v63 = vstv %s3032_s21  ;;  %s1887_s21 = scalar_lea.sflag [#allocation4], %s2907_s19 }
 0x108   : > { %v636_v0 = vadd.f32 %v634_v49, %v630_v47  ;;  %v638_v1 = vstv %s3034_s13  ;;  %v653_v2 = vmul.f32 %v652_v63, %v3003_v4  ;;  %v654_v3 = vmul.f32 %v652_v63, %v3005_v5 }
 0x109   : > { %v649_v6 = vadd.f32 %v647_v61, %v643_v58  ;;  %v650_v7 = vadd.f32 %v648_v62, %v644_v59  ;;  %v662_v8 = vstv %s3040_s29  ;;  %v666_v9 = vstv %s3042_s18  ;;  %v2142_v61 = vld.sshfl [vmem:[%s2913_s12] sm:$0x33 pattern:$0x75316420]  ;;  %s2573_s29 = smov [#allocation17]  }
 0x10a   : > { %v3084_v10 = vadd.f32 %v598_v22, %v595_v40  ;;  %v3086_v11 = vadd.f32 %v598_v22, %v596_v41  ;;  %v663_v12 = vmul.f32 %v662_v8, %v2967_v42  ;;  %v667_v13 = vmul.f32 %v666_v9, %v2980_v53  ;;  %s2475_s18 = sshll.u32 %s2573_s29, 4  ;;  %s2476_s18 = int_to_ptr.vmem [resolvable:$false] %s2475_s18 }
 0x10b   : > { %v3090_v14 = vadd.f32 %v618_v44, %v615_v56  ;;  %v3092_v15 = vadd.f32 %v618_v44, %v616_v57  ;;  %v3094_v16 = vadd.f32 %v638_v1, %v635_v60  ;;  %v658_v17 = vstv %s3050_s22  ;;  %s2477_s22 = scalar_lea.vmem %s2476_s18, 1024 }
 0x10c   : > { %v3099_v18 = vadd.f32 %v638_v1, %v636_v0  ;;  %v664_v19 = vmul.f32 %v662_v8, %v2969_v43  ;;  %v668_v20 = vmul.f32 %v666_v9, %v2982_v54  ;;  %v672_v21 = vstv %s3054_s15  ;;  %v2143_v1 = vld.sshfl [vmem:[%s2913_s12 + $0x4] sm:$0x33 pattern:$0x75316420] }
 0x10d   : > { %v655_v22 = vadd.f32 %v653_v2, %v649_v6  ;;  %v656_v24 = vadd.f32 %v654_v3, %v650_v7  ;;  %v682_v25 = vstv %s3062_s10  ;;  %v686_v26 = vstv %s3064_s1  ;;  %v2144_v2 = vld.sshfl [vmem:[%s2913_s12 + $0x8] sm:$0x33 pattern:$0x75316420] }
 0x10e   : > { %v669_v27 = vadd.f32 %v667_v13, %v663_v12  ;;  %v678_v28 = vstv %s3068_s11  ;;  %v683_v29 = vmul.f32 %v682_v25, %v2967_v42  ;;  %v684_v30 = vmul.f32 %v682_v25, %v2969_v43  ;;  %v3144_v3 = vld.sshfl [vmem:[%s2913_s12 + $0xc] sm:$0x33 pattern:$0x75316420] }
 0x10f   : > { %v673_v31 = vmul.f32 %v672_v21, %v3003_v4  ;;  %v687_v32 = vmul.f32 %v686_v26, %v2980_v53  ;;  %v688_v33 = vmul.f32 %v686_v26, %v2982_v54  ;;  %v692_v34 = vstv %s3073_s23 }
 0x110   : > { %v670_v35 = vadd.f32 %v668_v20, %v664_v19  ;;  %v674_v36 = vmul.f32 %v672_v21, %v3005_v5  ;;  %v693_v37 = vmul.f32 %v692_v34, %v3003_v4  ;;  %v694_v38 = vmul.f32 %v692_v34, %v3005_v5  ;;  %v3156_v21 = vld.sshfl [vmem:[%s2913_s12 + $0x14] sm:$0x33 pattern:$0x75316420] }
 0x111   : > { %v689_v39 = vadd.f32 %v687_v32, %v683_v29  ;;  %v690_v40 = vadd.f32 %v688_v33, %v684_v30  ;;  %v702_v41 = vstv %s3080_s0  ;;  %v706_v44 = vstv %s3082_s16  ;;  %v3172_v33 = vld.sshfl [vmem:[%s2913_s12 + $0x1c] sm:$0x33 pattern:$0x75316420] }
 0x112   : > { %v703_v45 = vmul.f32 %v702_v41, %v2967_v42  ;;  %v704_v46 = vmul.f32 %v702_v41, %v2969_v43  ;;  %v707_v47 = vmul.f32 %v706_v44, %v2980_v53  ;;  %v708_v48 = vmul.f32 %v706_v44, %v2982_v54  ;;  %v743_v44 = vld [vmem:[%s2921_s26] sm:$0xff] }
 0x113   : > { %v3126_v49 = vadd.f32 %v658_v17, %v655_v22  ;;  %v3128_v52 = vadd.f32 %v658_v17, %v656_v24  ;;  %v675_v55 = vadd.f32 %v673_v31, %v669_v27  ;;  %v712_v56 = vstv %s3097_s25  ;;  %v3151_v17 = vld.sshfl [vmem:[%s2913_s12 + $0x10] sm:$0x33 pattern:$0x75316420]  ;;  %v763_v41 = vld [vmem:[%s2921_s26 + $0xa0] sm:$0xff] }
 0x114   : > { %v709_v57 = vadd.f32 %v707_v47, %v703_v45  ;;  %v710_v58 = vadd.f32 %v708_v48, %v704_v46  ;;  %v713_v42 = vmul.f32 %v712_v56, %v3003_v4  ;;  %v714_v59 = vmul.f32 %v712_v56, %v3005_v5  ;;  %v3165_v27 = vld.sshfl [vmem:[%s2913_s12 + $0x18] sm:$0x33 pattern:$0x75316420]  ;;  %v744_v45 = vld [vmem:[%s2921_s26 + $0x8] sm:$0xff]  ;;  %s2151_s12 = sshll.u32 %s2643_s9, 7 }
 0x115   : > { %4094 = vst [vmem:[#allocation30_spill] sm:$0xff] %v3126_v49  ;;  %4095 = vst [vmem:[#allocation31_spill] sm:$0xff] %v3128_v52  ;;  %v676_v43 = vadd.f32 %v674_v36, %v670_v35  ;;  %v698_v60 = vstv %s3106_s14  ;;  %v721_v53 = vadd.f32 %v3084_v10, %v3056_v50  ;;  %v722_v54 = vadd.f32 %v3086_v11, %v3058_v51  ;;  %s3953_s20 = scalar_lea.hbm %s4024_s8, %s2151_s12 }
 0x116   : > { %v695_v62 = vadd.f32 %v693_v37, %v689_v39  ;;  %v696_v63 = vadd.f32 %v694_v38, %v690_v40  ;;  %v715_v0 = vadd.f32 %v713_v42, %v709_v57  ;;  %v2572_v6 = vmov 1966171168   ;;  %v760_v42 = vld [vmem:[%s2921_s26 + $0x88] sm:$0xff]  ;;  %v779_v37 = vld [vmem:[%s2921_s26 + $0x120] sm:$0xff] }
 0x117   : > { %v723_v4 = vadd.f32 %v721_v53, %v3090_v14  ;;  %v724_v5 = vadd.f32 %v722_v54, %v3092_v15  ;;  %v817_v7 = vunpack.c.l.s4 %v2572_v6  ;;  %v820_v8 = vshrl.u32 %v819_v23, 7  ;;  %v776_v53 = vld [vmem:[%s2921_s26 + $0x108] sm:$0xff]  ;;  %v791_v54 = vld [vmem:[%s2921_s26 + $0x180] sm:$0xff] }
 0x118   : > { %v3147_v9 = vadd.f32 %v678_v28, %v675_v55  ;;  %v716_v12 = vadd.f32 %v714_v59, %v710_v58  ;;  %v718_v13 = vstv %s3118_s5  ;;  %v815_v22 = vcombine.high %v2142_v61, %v2142_v61  ;;  %v759_v58 = vld [vmem:[%s2921_s26 + $0x80] sm:$0xff]  ;;  %v794_v55 = vld [vmem:[%s2921_s26 + $0x198] sm:$0xff]  ;;  %v764_v40 = vld [vmem:[%s2921_s26 + $0xa8] sm:$0xff] }
 0x119   : > { %v725_v19 = vadd.f32 %v723_v4, %v3094_v16  ;;  %v726_v20 = vadd.f32 %v724_v5, %v3099_v18  ;;  %v818_v24 = vunpack.c.0.s8 %v817_v7  ;;  %v3158_v25 = vadd.f32 %v678_v28, %v676_v43  ;;  %v775_v59 = vld [vmem:[%s2921_s26 + $0x100] sm:$0xff] }
 0x11a   : > { %4096 = vst [vmem:[#allocation32_spill] sm:$0xff] %v3147_v9  ;;  %v3160_v26 = vadd.f32 %v698_v60, %v695_v62  ;;  %v3162_v23 = vadd.f32 %v698_v60, %v696_v63  ;;  %v868_v29 = vcombine.high %v2143_v1, %v2143_v1  ;;  %v3167_v30 = vadd.f32 %v718_v13, %v715_v0 }
 0x11b   : > { %4097 = vst [vmem:[#allocation33_spill] sm:$0xff] %v3158_v25  ;;  %v727_v31 = vadd.f32 %v725_v19, %v3126_v49  ;;  %v728_v32 = vadd.f32 %v726_v20, %v3128_v52  ;;  %v3174_v34 = vsub.s32 %v818_v24, %v820_v8  ;;  %v3176_v28 = vadd.f32 %v718_v13, %v716_v12  ;;  %v746_v12 = vld [vmem:[%s2921_s26 + $0x18] sm:$0xff]  ;;  %v761_v24 = vld [vmem:[%s2921_s26 + $0x90] sm:$0xff] }
 0x11c   : > { %v3178_v35 = vsub.s32 0, %v820_v8  ;;  %v929_v36 = vcombine.high %v2144_v2, %v2144_v2  ;;  %v745_v8 = vld [vmem:[%s2921_s26 + $0x10] sm:$0xff] }
 0x11d   : > { %v822_v38 = vrot.slane %v2142_v61, %v3174_v34  ;;  %v829_v39 = vrot.slane %v815_v22, %v3174_v34  ;;  %v875_v46 = vrot.slane %v2143_v1, %v3174_v34  ;;  %v882_v47 = vrot.slane %v868_v29, %v3174_v34  ;;  %v792_v61 = vld [vmem:[%s2921_s26 + $0x188] sm:$0xff]  ;;  %v762_v29 = vld [vmem:[%s2921_s26 + $0x98] sm:$0xff] }
 0x11e   : > { %v3197_v56 = vadd.f32 %v727_v31, %v3147_v9  ;;  %v3200_v57 = vadd.f32 %v728_v32, %v3158_v25  ;;  %v936_v6 = vrot.slane %v2144_v2, %v3174_v34  ;;  %v943_v7 = vrot.slane %v929_v36, %v3174_v34  ;;  %v777_v31 = vld [vmem:[%s2921_s26 + $0x110] sm:$0xff] }
 0x11f   : > { %v830_v43 = vcombine.high %v822_v38, %v822_v38  ;;  %v831_v60 = vcombine.high %v829_v39, %v829_v39  ;;  %v835_v62 = vrot.slane %v822_v38, %v3178_v35  ;;  %v839_v63 = vrot.slane %v829_v39, %v3178_v35  ;;  %v793_v2 = vld [vmem:[%s2921_s26 + $0x190] sm:$0xff] }
 0x120   : > { %v883_v0 = vcombine.high %v875_v46, %v875_v46  ;;  %v884_v1 = vcombine.high %v882_v47, %v882_v47  ;;  %v888_v36 = vrot.slane %v875_v46, %v3178_v35  ;;  %v892_v48 = vrot.slane %v882_v47, %v3178_v35  ;;  %v747_v47 = vld [vmem:[%s2921_s26 + $0x20] sm:$0xff] }
 0x121   : > { %v843_v4 = vrot.slane %v830_v43, %v3178_v35  ;;  %v847_v5 = vrot.slane %v831_v60, %v3178_v35  ;;  %v852_v13 = vmul.f32 %v835_v62, %v743_v44  ;;  %v853_v19 = vmul.f32 %v835_v62, %v744_v45  ;;  %v778_v60 = vld [vmem:[%s2921_s26 + $0x118] sm:$0xff] }
 0x122   : > { %v854_v20 = vmul.f32 %v839_v63, %v759_v58  ;;  %v855_v22 = vmul.f32 %v839_v63, %v760_v42  ;;  %v896_v44 = vrot.slane %v883_v0, %v3178_v35  ;;  %v900_v45 = vrot.slane %v884_v1, %v3178_v35  ;;  %v748_v63 = vld [vmem:[%s2921_s26 + $0x28] sm:$0xff] }
 0x123   : > { %v856_v32 = vmul.f32 %v843_v4, %v775_v59  ;;  %v857_v38 = vmul.f32 %v843_v4, %v776_v53  ;;  %v858_v39 = vmul.f32 %v847_v5, %v791_v54  ;;  %v859_v43 = vmul.f32 %v847_v5, %v792_v61 }
 0x124   : > { %v944_v58 = vcombine.high %v936_v6, %v936_v6  ;;  %v945_v42 = vcombine.high %v943_v7, %v943_v7  ;;  %v949_v59 = vrot.slane %v936_v6, %v3178_v35  ;;  %v953_v53 = vrot.slane %v943_v7, %v3178_v35 }
 0x125   : > { %v905_v54 = vmul.f32 %v888_v36, %v745_v8  ;;  %v906_v61 = vmul.f32 %v888_v36, %v746_v12  ;;  %v907_v62 = vmul.f32 %v892_v48, %v761_v24  ;;  %v908_v46 = vmul.f32 %v892_v48, %v762_v29  ;;  %v780_v8 = vld [vmem:[%s2921_s26 + $0x128] sm:$0xff]  ;;  %v795_v12 = vld [vmem:[%s2921_s26 + $0x1a0] sm:$0xff] }
 0x126   : > { %v909_v0 = vmul.f32 %v896_v44, %v777_v31  ;;  %v910_v4 = vmul.f32 %v896_v44, %v778_v60  ;;  %v911_v1 = vmul.f32 %v900_v45, %v793_v2  ;;  %v912_v5 = vmul.f32 %v900_v45, %v794_v55  ;;  %v796_v36 = vld [vmem:[%s2921_s26 + $0x1a8] sm:$0xff] }
 0x127   : > { %v913_v25 = vadd.f32 %v905_v54, %v852_v13  ;;  %v914_v6 = vadd.f32 %v906_v61, %v853_v19  ;;  %v915_v9 = vadd.f32 %v907_v62, %v854_v20  ;;  %v916_v7 = vadd.f32 %v908_v46, %v855_v22  ;;  %v765_v61 = vld [vmem:[%s2921_s26 + $0xb0] sm:$0xff]  ;;  %v766_v62 = vld [vmem:[%s2921_s26 + $0xb8] sm:$0xff] }
 0x128   : > { %v917_v24 = vadd.f32 %v909_v0, %v856_v32  ;;  %v918_v52 = vadd.f32 %v910_v4, %v857_v38  ;;  %v919_v48 = vadd.f32 %v911_v1, %v858_v39  ;;  %v920_v29 = vadd.f32 %v912_v5, %v859_v43  ;;  %v798_v0 = vld [vmem:[%s2921_s26 + $0x1b8] sm:$0xff] }
 0x129   : > { %v957_v49 = vrot.slane %v944_v58, %v3178_v35  ;;  %v961_v31 = vrot.slane %v945_v42, %v3178_v35  ;;  %v966_v55 = vmul.f32 %v949_v59, %v747_v47  ;;  %v967_v60 = vmul.f32 %v949_v59, %v748_v63  ;;  %v749_v58 = vld [vmem:[%s2921_s26 + $0x30] sm:$0xff]  ;;  %v750_v42 = vld [vmem:[%s2921_s26 + $0x38] sm:$0xff] }
 0x12a   : > { %v968_v2 = vmul.f32 %v953_v53, %v763_v41  ;;  %v969_v13 = vmul.f32 %v953_v53, %v764_v40  ;;  %v997_v19 = vrot.slane %v3144_v3, %v3174_v34  ;;  %v4098_v20 = vcombine.high %v3144_v3, %v3144_v3  ;;  %v782_v63 = vld [vmem:[%s2921_s26 + $0x138] sm:$0xff] }
 0x12b   : > { %v970_v32 = vmul.f32 %v957_v49, %v779_v37  ;;  %v971_v38 = vmul.f32 %v957_v49, %v780_v8  ;;  %v972_v39 = vmul.f32 %v961_v31, %v795_v12  ;;  %v973_v43 = vmul.f32 %v961_v31, %v796_v36  ;;  %v781_v37 = vld [vmem:[%s2921_s26 + $0x130] sm:$0xff] }
 0x12c   : > { %v1004_v22 = vrot.slane %v4098_v20, %v3174_v34  ;;  %v974_v44 = vadd.f32 %v966_v55, %v913_v25  ;;  %v975_v45 = vadd.f32 %v967_v60, %v914_v6  ;;  %v976_v41 = vadd.f32 %v968_v2, %v915_v9  ;;  %v797_v9 = vld [vmem:[%s2921_s26 + $0x1b0] sm:$0xff] }
 0x12d   : > { %v977_v40 = vadd.f32 %v969_v13, %v916_v7  ;;  %v978_v59 = vadd.f32 %v970_v32, %v917_v24  ;;  %v979_v53 = vadd.f32 %v971_v38, %v918_v52  ;;  %v980_v3 = vadd.f32 %v972_v39, %v919_v48  ;;  %v751_v13 = vld [vmem:[%s2921_s26 + $0x40] sm:$0xff] }
 0x12e   : > { %v981_v54 = vadd.f32 %v973_v43, %v920_v29  ;;  %v1005_v46 = vcombine.high %v997_v19, %v997_v19  ;;  %v1006_v49 = vcombine.high %v1004_v22, %v1004_v22  ;;  %v1010_v47 = vrot.slane %v997_v19, %v3178_v35  ;;  %v752_v19 = vld [vmem:[%s2921_s26 + $0x48] sm:$0xff]  ;;  %v767_v39 = vld [vmem:[%s2921_s26 + $0xc0] sm:$0xff] }
 0x12f   : > { %v1014_v25 = vrot.slane %v1004_v22, %v3178_v35  ;;  %v1058_v4 = vrot.slane %v3151_v17, %v3174_v34  ;;  %v4099_v52 = vcombine.high %v3151_v17, %v3151_v17  ;;  %v3262_v5 = vrot.slane %v3156_v21, %v3174_v34  ;;  %v768_v43 = vld [vmem:[%s2921_s26 + $0xc8] sm:$0xff] }
 0x130   : > { %v4100_v6 = vcombine.high %v3156_v21, %v3156_v21  ;;  %v1018_v8 = vrot.slane %v1005_v46, %v3178_v35  ;;  %v1022_v12 = vrot.slane %v1006_v49, %v3178_v35  ;;  %v1027_v36 = vmul.f32 %v1010_v47, %v749_v58  ;;  %v783_v58 = vld [vmem:[%s2921_s26 + $0x140] sm:$0xff] }
 0x131   : > { %v1065_v1 = vrot.slane %v4099_v52, %v3174_v34  ;;  %v1028_v17 = vmul.f32 %v1010_v47, %v750_v42  ;;  %v1029_v24 = vmul.f32 %v1014_v25, %v765_v61  ;;  %v1030_v48 = vmul.f32 %v1014_v25, %v766_v62  ;;  %v799_v49 = vld [vmem:[%s2921_s26 + $0x1c0] sm:$0xff]  ;;  %v800_v47 = vld [vmem:[%s2921_s26 + $0x1c8] sm:$0xff]  ;;  %v754_v52 = vld [vmem:[%s2921_s26 + $0x58] sm:$0xff] }
 0x132   : > { %v3268_v7 = vrot.slane %v4100_v6, %v3174_v34  ;;  %v1066_v29 = vcombine.high %v1058_v4, %v1058_v4  ;;  %v1031_v55 = vmul.f32 %v1018_v8, %v781_v37  ;;  %v1032_v60 = vmul.f32 %v1018_v8, %v782_v63  ;;  %v784_v37 = vld [vmem:[%s2921_s26 + $0x148] sm:$0xff] }
 0x133   : > { %v1067_v31 = vcombine.high %v1065_v1, %v1065_v1  ;;  %v1033_v2 = vmul.f32 %v1022_v12, %v797_v9  ;;  %v1034_v21 = vmul.f32 %v1022_v12, %v798_v0  ;;  %v1035_v20 = vadd.f32 %v1027_v36, %v974_v44  ;;  %v769_v36 = vld [vmem:[%s2921_s26 + $0xd0] sm:$0xff] }
 0x134   : > { %v1036_v22 = vadd.f32 %v1028_v17, %v975_v45  ;;  %v1037_v32 = vadd.f32 %v1029_v24, %v976_v41  ;;  %v1038_v38 = vadd.f32 %v1030_v48, %v977_v40  ;;  %v1039_v42 = vadd.f32 %v1031_v55, %v978_v59  ;;  %v770_v17 = vld [vmem:[%s2921_s26 + $0xd8] sm:$0xff]  ;;  %v785_v24 = vld [vmem:[%s2921_s26 + $0x150] sm:$0xff] }
 0x135   : > { %v1040_v61 = vadd.f32 %v1032_v60, %v979_v53  ;;  %v1041_v62 = vadd.f32 %v1033_v2, %v980_v3  ;;  %v1042_v46 = vadd.f32 %v1034_v21, %v981_v54  ;;  %v1071_v25 = vrot.slane %v1058_v4, %v3178_v35  ;;  %v753_v4 = vld [vmem:[%s2921_s26 + $0x50] sm:$0xff]  ;;  %v802_v60 = vld [vmem:[%s2921_s26 + $0x1d8] sm:$0xff] }
 0x136   : > { %v1075_v63 = vrot.slane %v1065_v1, %v3178_v35  ;;  %v1079_v44 = vrot.slane %v1066_v29, %v3178_v35  ;;  %v1083_v45 = vrot.slane %v1067_v31, %v3178_v35  ;;  %v1127_v41 = vcombine.high %v3262_v5, %v3262_v5  ;;  %v786_v31 = vld [vmem:[%s2921_s26 + $0x158] sm:$0xff]  ;;  %v801_v55 = vld [vmem:[%s2921_s26 + $0x1d0] sm:$0xff] }
 0x137   : > { %v1128_v40 = vcombine.high %v3268_v7, %v3268_v7  ;;  %v1132_v59 = vrot.slane %v3262_v5, %v3178_v35  ;;  %v1136_v53 = vrot.slane %v3268_v7, %v3178_v35  ;;  %v1088_v3 = vmul.f32 %v1071_v25, %v751_v13 }
 0x138   : > { %v1089_v54 = vmul.f32 %v1071_v25, %v752_v19  ;;  %v1090_v9 = vmul.f32 %v1075_v63, %v767_v39  ;;  %v1091_v0 = vmul.f32 %v1075_v63, %v768_v43  ;;  %v1092_v1 = vmul.f32 %v1079_v44, %v783_v58 }
 0x139   : > { %v1093_v6 = vmul.f32 %v1079_v44, %v784_v37  ;;  %v1094_v8 = vmul.f32 %v1083_v45, %v799_v49  ;;  %v1095_v12 = vmul.f32 %v1083_v45, %v800_v47  ;;  %v1096_v5 = vadd.f32 %v1088_v3, %v1035_v20  ;;  %v756_v45 = vld [vmem:[%s2921_s26 + $0x68] sm:$0xff]  ;;  %v771_v3 = vld [vmem:[%s2921_s26 + $0xe0] sm:$0xff] }
 0x13a   : > { %v1097_v48 = vadd.f32 %v1089_v54, %v1036_v22  ;;  %v1098_v29 = vadd.f32 %v1090_v9, %v1037_v32  ;;  %v1099_v7 = vadd.f32 %v1091_v0, %v1038_v38  ;;  %v1100_v2 = vadd.f32 %v1092_v1, %v1039_v42  ;;  %v772_v54 = vld [vmem:[%s2921_s26 + $0xe8] sm:$0xff]  ;;  %v787_v9 = vld [vmem:[%s2921_s26 + $0x160] sm:$0xff] }
 0x13b   : > { %v1101_v21 = vadd.f32 %v1093_v6, %v1040_v61  ;;  %v1102_v13 = vadd.f32 %v1094_v8, %v1041_v62  ;;  %v1103_v19 = vadd.f32 %v1095_v12, %v1042_v46  ;;  %v1140_v39 = vrot.slane %v1127_v41, %v3178_v35  ;;  %v803_v1 = vld [vmem:[%s2921_s26 + $0x1e0] sm:$0xff]  ;;  %v804_v6 = vld [vmem:[%s2921_s26 + $0x1e8] sm:$0xff] }
 0x13c   : > { %v1144_v43 = vrot.slane %v1128_v40, %v3178_v35  ;;  %v1149_v58 = vmul.f32 %v1132_v59, %v753_v4  ;;  %v1150_v37 = vmul.f32 %v1132_v59, %v754_v52  ;;  %v1151_v49 = vmul.f32 %v1136_v53, %v769_v36  ;;  %v788_v52 = vld [vmem:[%s2921_s26 + $0x168] sm:$0xff] }
 0x13d   : > { %v1152_v20 = vmul.f32 %v1136_v53, %v770_v17  ;;  %v1180_v22 = vrot.slane %v3165_v27, %v3174_v34  ;;  %v4101_v32 = vcombine.high %v3165_v27, %v3165_v27  ;;  %v1153_v42 = vmul.f32 %v1140_v39, %v785_v24  ;;  %v755_v27 = vld [vmem:[%s2921_s26 + $0x60] sm:$0xff] }
 0x13e   : > { %v1154_v61 = vmul.f32 %v1140_v39, %v786_v31  ;;  %v1155_v62 = vmul.f32 %v1144_v43, %v801_v55  ;;  %v1156_v46 = vmul.f32 %v1144_v43, %v802_v60  ;;  %v731_v47 = vadd.f32 %v3197_v56, %v3160_v26  ;;  %v757_v43 = vld [vmem:[%s2921_s26 + $0x70] sm:$0xff] }
 0x13f   : > { %v1187_v38 = vrot.slane %v4101_v32, %v3174_v34  ;;  %v732_v25 = vadd.f32 %v3200_v57, %v3162_v23  ;;  %v1157_v63 = vadd.f32 %v1149_v58, %v1096_v5  ;;  %v1158_v44 = vadd.f32 %v1150_v37, %v1097_v48  ;;  %v758_v58 = vld [vmem:[%s2921_s26 + $0x78] sm:$0xff]  ;;  %v773_v37 = vld [vmem:[%s2921_s26 + $0xf0] sm:$0xff] }
 0x140   : > { %v1159_v41 = vadd.f32 %v1151_v49, %v1098_v29  ;;  %v1160_v40 = vadd.f32 %v1152_v20, %v1099_v7  ;;  %v1161_v59 = vadd.f32 %v1153_v42, %v1100_v2  ;;  %v1162_v53 = vadd.f32 %v1154_v61, %v1101_v21  ;;  %v774_v49 = vld [vmem:[%s2921_s26 + $0xf8] sm:$0xff]  ;;  %v789_v20 = vld [vmem:[%s2921_s26 + $0x170] sm:$0xff] }
 0x141   : > { %v1188_v0 = vcombine.high %v1180_v22, %v1180_v22  ;;  %v1189_v4 = vcombine.high %v1187_v38, %v1187_v38  ;;  %v1193_v56 = vrot.slane %v1180_v22, %v3178_v35  ;;  %v1197_v57 = vrot.slane %v1187_v38, %v3178_v35  ;;  %v790_v61 = vld [vmem:[%s2921_s26 + $0x178] sm:$0xff] }
 0x142   : > { %v1163_v8 = vadd.f32 %v1155_v62, %v1102_v13  ;;  %v1164_v12 = vadd.f32 %v1156_v46, %v1103_v19  ;;  %v1241_v36 = vrot.slane %v3172_v33, %v3174_v34  ;;  %v4102_v17 = vcombine.high %v3172_v33, %v3172_v33  ;;  %v805_v62 = vld [vmem:[%s2921_s26 + $0x1f0] sm:$0xff]  ;;  %v806_v46 = vld [vmem:[%s2921_s26 + $0x1f8] sm:$0xff]  ;;  %s488_s26 = scalar_lea.vmem [#allocation17], %s2098_s24 }
 0x143   : > { %v1201_v5 = vrot.slane %v1188_v0, %v3178_v35  ;;  %v1205_v48 = vrot.slane %v1189_v4, %v3178_v35  ;;  %v1210_v29 = vmul.f32 %v1193_v56, %v755_v27  ;;  %v1211_v7 = vmul.f32 %v1193_v56, %v756_v45 }
 0x144   : > { %v1248_v24 = vrot.slane %v4102_v17, %v3174_v34  ;;  %v1212_v31 = vmul.f32 %v1197_v57, %v771_v3  ;;  %v1213_v55 = vmul.f32 %v1197_v57, %v772_v54  ;;  %v1249_v60 = vcombine.high %v1241_v36, %v1241_v36 }
 0x145   : > { %v1214_v21 = vmul.f32 %v1201_v5, %v787_v9  ;;  %v1215_v33 = vmul.f32 %v1201_v5, %v788_v52  ;;  %v1216_v34 = vmul.f32 %v1205_v48, %v803_v1  ;;  %v1217_v13 = vmul.f32 %v1205_v48, %v804_v6 }
 0x146   : > { %v1250_v2 = vcombine.high %v1248_v24, %v1248_v24  ;;  %v733_v19 = vadd.f32 %v731_v47, %v3167_v30  ;;  %v734_v39 = vadd.f32 %v732_v25, %v3176_v28  ;;  %v1218_v22 = vadd.f32 %v1210_v29, %v1157_v63 }
 0x147   : > { %v1219_v32 = vadd.f32 %v1211_v7, %v1158_v44  ;;  %v1220_v38 = vadd.f32 %v1212_v31, %v1159_v41  ;;  %v1221_v42 = vadd.f32 %v1213_v55, %v1160_v40  ;;  %v1254_v27 = vrot.slane %v1241_v36, %v3178_v35 }
 0x148   : > { %v1258_v45 = vrot.slane %v1248_v24, %v3178_v35  ;;  %v1262_v47 = vrot.slane %v1249_v60, %v3178_v35  ;;  %v1266_v25 = vrot.slane %v1250_v2, %v3178_v35  ;;  %v1222_v3 = vadd.f32 %v1214_v21, %v1161_v59 }
 0x149   : > { %v1223_v54 = vadd.f32 %v1215_v33, %v1162_v53  ;;  %v1224_v9 = vadd.f32 %v1216_v34, %v1163_v8  ;;  %v1225_v0 = vadd.f32 %v1217_v13, %v1164_v12  ;;  %v1271_v4 = vmul.f32 %v1254_v27, %v757_v43 }
 0x14a   : > { %v1272_v63 = vmul.f32 %v1254_v27, %v758_v58  ;;  %v1273_v44 = vmul.f32 %v1258_v45, %v773_v37  ;;  %v1274_v41 = vmul.f32 %v1258_v45, %v774_v49  ;;  %v1275_v40 = vmul.f32 %v1262_v47, %v789_v20 }
 0x14b   : > { %v1276_v56 = vmul.f32 %v1262_v47, %v790_v61  ;;  %v1277_v57 = vmul.f32 %v1266_v25, %v805_v62  ;;  %v1278_v52 = vmul.f32 %v1266_v25, %v806_v46  ;;  %v1279_v1 = vadd.f32 %v1271_v4, %v1218_v22 }
 0x14c   : > { %v1280_v6 = vadd.f32 %v1272_v63, %v1219_v32  ;;  %v1281_v36 = vadd.f32 %v1273_v44, %v1220_v38  ;;  %v1282_v17 = vadd.f32 %v1274_v41, %v1221_v42  ;;  %v1283_v24 = vadd.f32 %v1275_v40, %v1222_v3 }
 0x14d   : > { %v1284_v5 = vadd.f32 %v1276_v56, %v1223_v54  ;;  %v1285_v48 = vadd.f32 %v1277_v57, %v1224_v9  ;;  %v1286_v35 = vadd.f32 %v1278_v52, %v1225_v0  ;;  %v1287_v59 = vadd.f32 %v1279_v1, %v733_v19 }
 0x14e   : > { %v1288_v53 = vadd.f32 %v1280_v6, %v734_v39  ;;  %v1289_v8 = vadd.f32 %v1281_v36, %v733_v19  ;;  %v1290_v12 = vadd.f32 %v1282_v17, %v734_v39  ;;  %v1291_v29 = vadd.f32 %v1283_v24, %v733_v19 }
 0x14f   : > { %v1292_v7 = vadd.f32 %v1284_v5, %v734_v39  ;;  %v1293_v31 = vadd.f32 %v1285_v48, %v733_v19  ;;  %v1294_v55 = vadd.f32 %v1286_v35, %v734_v39  ;;  %v1295_v60 = vmul.f32 0.17677669, %v1287_v59 }
 0x150   : > { %v1296_v2 = vmul.f32 0.17677669, %v1288_v53  ;;  %v1297_v21 = vmul.f32 0.17677669, %v1289_v8  ;;  %v1298_v33 = vmul.f32 0.17677669, %v1290_v12 }
 0x151   : > { %v1299_v34 = vmul.f32 0.17677669, %v1291_v29  ;;  %v1300_v13 = vmul.f32 0.17677669, %v1292_v7  ;;  %v1301_v43 = vmul.f32 0.17677669, %v1293_v31 }
 0x152   : > { %v1302_v58 = vmul.f32 0.17677669, %v1294_v55  ;;  %v1303_v37 = vmax.f32 %v1295_v60, %v1296_v2  ;;  %v1310_v49 = vmax.f32 %v1297_v21, %v1298_v33 }
 0x153   : > { %v1317_v20 = vmax.f32 %v1299_v34, %v1300_v13 }
 0x154   : > { %v1304_v22 = vrot.slane %v1303_v37, 4  ;;  %v1324_v32 = vmax.f32 %v1301_v43, %v1302_v58  ;;  %v1311_v38 = vrot.slane %v1310_v49, 4 }
 0x155   : > { %v1318_v42 = vrot.slane %v1317_v20, 4 }
 0x156   : > { %v1305_v61 = vmax.f32 %v1303_v37, %v1304_v22  ;;  %v1325_v62 = vrot.slane %v1324_v32, 4  ;;  %v1312_v46 = vmax.f32 %v1310_v49, %v1311_v38  ;;  %v1398_v37 = vld [vmem:[%s2928_s27 + $0x18] sm:$0xff]  ;;  %v1399_v49 = vld [vmem:[%s2928_s27 + $0x20] sm:$0xff]  ;;  %v1400_v38 = vld [vmem:[%s2928_s27 + $0x28] sm:$0xff] }
 0x157   : > { %v1319_v19 = vmax.f32 %v1317_v20, %v1318_v42  ;;  %v1401_v42 = vld [vmem:[%s2928_s27 + $0x30] sm:$0xff] }
 0x158   : > { %v1306_v39 = vrot.slane %v1305_v61, 2  ;;  %v1326_v27 = vmax.f32 %v1324_v32, %v1325_v62  ;;  %v1313_v45 = vrot.slane %v1312_v46, 2 }
 0x159   : > { %v1320_v47 = vrot.slane %v1319_v19, 2 }
 0x15a   : > { %v1307_v25 = vmax.f32 %v1305_v61, %v1306_v39  ;;  %v1327_v3 = vrot.slane %v1326_v27, 2  ;;  %v1314_v54 = vmax.f32 %v1312_v46, %v1313_v45  ;;  %v1402_v61 = vld [vmem:[%s2928_s27 + $0x38] sm:$0xff]  ;;  %v1403_v46 = vld [vmem:[%s2928_s27 + $0x40] sm:$0xff] }
 0x15b   : > { %v1321_v9 = vmax.f32 %v1319_v19, %v1320_v47 }
 0x15c   : > { %v1308_v0 = vrot.slane %v1307_v25, 1  ;;  %v1328_v4 = vmax.f32 %v1326_v27, %v1327_v3  ;;  %v1315_v63 = vrot.slane %v1314_v54, 1 }
 0x15d   : > { %v1322_v44 = vrot.slane %v1321_v9, 1 }
 0x15e   : > { %v1309_v41 = vmax.f32 %v1307_v25, %v1308_v0  ;;  %v1329_v40 = vrot.slane %v1328_v4, 1  ;;  %v1316_v56 = vmax.f32 %v1314_v54, %v1315_v63  ;;  %v1404_v54 = vld [vmem:[%s2928_s27 + $0x48] sm:$0xff]  ;;  %v1406_v0 = vld [vmem:[%s2928_s27 + $0x58] sm:$0xff] }
 0x15f   : > { %v1323_v57 = vmax.f32 %v1321_v9, %v1322_v44  ;;  %v1405_v9 = vld [vmem:[%s2928_s27 + $0x50] sm:$0xff]  ;;  %v1407_v44 = vld [vmem:[%s2928_s27 + $0x60] sm:$0xff] }
 0x160   : > { %v1330_v52 = vmax.f32 %v1328_v4, %v1329_v40  ;;  %v1331_v1 = vsub.f32 %v1295_v60, %v1309_v41  ;;  %v1332_v6 = vsub.f32 %v1296_v2, %v1309_v41  ;;  %v1333_v36 = vsub.f32 %v1297_v21, %v1316_v56 }
 0x161   : > { %v1334_v17 = vsub.f32 %v1298_v33, %v1316_v56  ;;  %v1335_v24 = vsub.f32 %v1299_v34, %v1323_v57  ;;  %v1336_v5 = vsub.f32 %v1300_v13, %v1323_v57  ;;  %v1395_v34 = vld [vmem:[%s2928_s27] sm:$0xff]  ;;  %v1396_v13 = vld [vmem:[%s2928_s27 + $0x8] sm:$0xff]  ;;  %v3386_v4 = vadd.f32 %v1398_v37, %v3086_v11  ;;  %v1413_v37 = vld [vmem:[%s2928_s27 + $0x90] sm:$0xff] }
 0x162   : > { %v1337_v48 = vsub.f32 %v1301_v43, %v1330_v52  ;;  %v1339_v35 = vmul.f32 1.442695, %v1331_v1  ;;  %v1341_v59 = vmul.f32 1.442695, %v1332_v6  ;;  %v1338_v53 = vsub.f32 %v1302_v58, %v1330_v52  ;;  %v1397_v43 = vld [vmem:[%s2928_s27 + $0x10] sm:$0xff] }
 0x163   : > { %v1343_v8 = vmul.f32 1.442695, %v1333_v36  ;;  %v1345_v12 = vmul.f32 1.442695, %v1334_v17  ;;  %v1347_v29 = vmul.f32 1.442695, %v1335_v24  ;;  %v3370_v19 = vadd.f32 %v1395_v34, %v3056_v50 }
 0x164   : > { %2267 = vpow2.f32 %v1339_v35  ;;  %v1349_v7 = vmul.f32 1.442695, %v1336_v5  ;;  %v1351_v31 = vmul.f32 1.442695, %v1337_v48  ;;  %v1353_v55 = vmul.f32 1.442695, %v1338_v53 }
 0x165   : > { %2269 = vpow2.f32 %v1341_v59  ;;  %v3373_v39 = vadd.f32 %v1396_v13, %v3058_v51  ;;  %v3376_v27 = vadd.f32 %v1397_v43, %v3084_v10  ;;  %v3392_v41 = vadd.f32 %v1399_v49, %v3090_v14  ;;  %v1408_v17 = vld [vmem:[%s2928_s27 + $0x68] sm:$0xff]  ;;  %v1409_v24 = vld [vmem:[%s2928_s27 + $0x70] sm:$0xff]  ;;  %v1410_v5 = vld [vmem:[%s2928_s27 + $0x78] sm:$0xff] }
 0x166   : > { %2271 = vpow2.f32 %v1343_v8  ;;  %v3395_v40 = vadd.f32 %v1400_v38, %v3092_v15  ;;  %v3398_v56 = vadd.f32 %v1401_v42, %v3094_v16  ;;  %v3401_v57 = vadd.f32 %v1402_v61, %v3099_v18  ;;  %v1411_v48 = vld [vmem:[%s2928_s27 + $0x80] sm:$0xff]  ;;  %v4105_v53 = vld [vmem:[#allocation31_spill] sm:$0xff]  ;;  %v1414_v49 = vld [vmem:[%s2928_s27 + $0x98] sm:$0xff] }
 0x167   : > { %2273 = vpow2.f32 %v1345_v12  ;;  %v4104_v35 = vld [vmem:[#allocation30_spill] sm:$0xff]  ;;  %v3413_v8 = vadd.f32 %v1404_v54, %v4105_v53  ;;  %v4106_v12 = vld [vmem:[#allocation32_spill] sm:$0xff]  ;;  %v1412_v43 = vld [vmem:[%s2928_s27 + $0x88] sm:$0xff]  ;;  %v3427_v38 = vadd.f32 %v1407_v44, %v3160_v26  ;;  %v3430_v42 = vadd.f32 %v1408_v17, %v3162_v23 }
 0x168   : > { %2275 = vpow2.f32 %v1347_v29  ;;  %v3410_v59 = vadd.f32 %v1403_v46, %v4104_v35  ;;  %v3416_v29 = vadd.f32 %v1405_v9, %v4106_v12  ;;  %v3433_v61 = vadd.f32 %v1409_v24, %v3167_v30  ;;  %v1417_v9 = vld [vmem:[%s2928_s27 + $0xb0] sm:$0xff]  ;;  %v1419_v44 = vld [vmem:[%s2928_s27 + $0xc0] sm:$0xff]  ;;  %v1422_v17 = vld [vmem:[%s2928_s27 + $0xd8] sm:$0xff] }
 0x169   : > { %2277 = vpow2.f32 %v1349_v7  ;;  %v4107_v7 = vld [vmem:[#allocation33_spill] sm:$0xff]  ;;  %4108 = vst [vmem:[#allocation30_spill] sm:$0xff] %v3427_v38  ;;  %4109 = vst [vmem:[#allocation31_spill] sm:$0xff] %v3430_v42  ;;  %v3436_v46 = vadd.f32 %v1410_v5, %v3176_v28  ;;  %v3445_v24 = vadd.f32 %v1411_v48, %v3056_v50  ;;  %v3448_v5 = vadd.f32 %v1412_v43, %v3058_v51  ;;  %v1423_v42 = vld [vmem:[%s2928_s27 + $0xe0] sm:$0xff] }
 0x16a   : > { %2279 = vpow2.f32 %v1351_v31  ;;  %v3419_v31 = vadd.f32 %v1406_v0, %v4107_v7  ;;  %4110 = vst [vmem:[#allocation32_spill] sm:$0xff] %v3433_v61  ;;  %v1418_v0 = vld [vmem:[%s2928_s27 + $0xb8] sm:$0xff]  ;;  %v1424_v38 = vld [vmem:[%s2928_s27 + $0xe8] sm:$0xff]  ;;  %v1425_v48 = vld [vmem:[%s2928_s27 + $0xf0] sm:$0xff] }
 0x16b   : > { %2281 = vpow2.f32 %v1353_v55  ;;  %4111 = vst [vmem:[#allocation33_spill] sm:$0xff] %v3436_v46  ;;  %4112 = vst [vmem:[#allocation35_spill] sm:$0xff] %v3445_v24  ;;  %v1426_v43 = vld [vmem:[%s2928_s27 + $0xf8] sm:$0xff]  ;;  %v1429_v24 = vld [vmem:[%s2928_s27 + $0x110] sm:$0xff] }
 0x16c   : > { %4113 = vst [vmem:[#allocation36_spill] sm:$0xff] %v3448_v5  ;;  %v1427_v5 = vld [vmem:[%s2928_s27 + $0x100] sm:$0xff] }
 0x16e   : > { %v3344_v60 = vpop.eup %2267 }
 0x16f   : > { %v3346_v2 = vpop.eup %2269 }
 0x170   : > { %v3348_v21 = vpop.eup %2271  ;;  %v1355_v33 = vadd.f32 %v3346_v2, %v3344_v60 }
 0x171   : > { %v3355_v58 = vpop.eup %2273 }
 0x172   : > { %v3359_v20 = vpop.eup %2275  ;;  %v1356_v22 = vrot.slane %v1355_v33, 4  ;;  %v1362_v32 = vadd.f32 %v3355_v58, %v3348_v21 }
 0x173   : > { %v3366_v62 = vpop.eup %2277 }
 0x174   : > { %v3378_v45 = vpop.eup %2279  ;;  %v1357_v47 = vadd.f32 %v1356_v22, %v1355_v33  ;;  %v1363_v25 = vrot.slane %v1362_v32, 4  ;;  %v1369_v3 = vadd.f32 %v3366_v62, %v3359_v20  ;;  %v1415_v22 = vld [vmem:[%s2928_s27 + $0xa0] sm:$0xff] }
 0x175   : > { %v3388_v63 = vpop.eup %2281 }
 0x176   : > { %4103 = vst [vmem:[#allocation34_spill] sm:$0xff] %v3388_v63  ;;  %v1358_v52 = vrot.slane %v1357_v47, 2  ;;  %v1364_v1 = vadd.f32 %v1363_v25, %v1362_v32  ;;  %v1370_v6 = vrot.slane %v1369_v3, 4  ;;  %v1376_v36 = vadd.f32 %v3388_v63, %v3378_v45  ;;  %v1416_v32 = vld [vmem:[%s2928_s27 + $0xa8] sm:$0xff]  ;;  %v1430_v63 = vld [vmem:[%s2928_s27 + $0x118] sm:$0xff] }
 0x178   : > { %v1359_v55 = vadd.f32 %v1358_v52, %v1357_v47  ;;  %v1365_v33 = vrot.slane %v1364_v1, 2  ;;  %v1371_v34 = vadd.f32 %v1370_v6, %v1369_v3  ;;  %v1377_v13 = vrot.slane %v1376_v36, 4  ;;  %v1420_v52 = vld [vmem:[%s2928_s27 + $0xc8] sm:$0xff]  ;;  %v1421_v6 = vld [vmem:[%s2928_s27 + $0xd0] sm:$0xff] }
 0x17a   : > { %v1360_v47 = vrot.slane %v1359_v55, 1  ;;  %v1366_v25 = vadd.f32 %v1365_v33, %v1364_v1  ;;  %v1372_v3 = vrot.slane %v1371_v34, 2  ;;  %v1378_v54 = vadd.f32 %v1377_v13, %v1376_v36 }
 0x17b   : > { %v3451_v1 = vadd.f32 %v1413_v37, %v3084_v10  ;;  %v3454_v36 = vadd.f32 %v1414_v49, %v3086_v11  ;;  %v1428_v37 = vld [vmem:[%s2928_s27 + $0x108] sm:$0xff]  ;;  %v3472_v49 = vadd.f32 %v1418_v0, %v3099_v18 }
 0x17c   : > { %v1361_v33 = vadd.f32 %v1360_v47, %v1359_v55  ;;  %v1367_v13 = vrot.slane %v1366_v25, 1  ;;  %v1373_v46 = vadd.f32 %v1372_v3, %v1371_v34  ;;  %v1379_v61 = vrot.slane %v1378_v54, 2 }
 0x17d   : > { %4114 = vst [vmem:[#allocation37_spill] sm:$0xff] %v3451_v1  ;;  %4115 = vst [vmem:[#allocation38_spill] sm:$0xff] %v3454_v36  ;;  %v3463_v1 = vadd.f32 %v1415_v22, %v3090_v14  ;;  %v3466_v55 = vadd.f32 %v1416_v32, %v3092_v15  ;;  %v3469_v34 = vadd.f32 %v1417_v9, %v3094_v16  ;;  %v1431_v22 = vld [vmem:[%s2928_s27 + $0x120] sm:$0xff]  ;;  %v1432_v32 = vld [vmem:[%s2928_s27 + $0x128] sm:$0xff] }
 0x17e   : > { %4119 = vst [vmem:[#allocation42_spill] sm:$0xff] %v3472_v49  ;;  %v1368_v47 = vadd.f32 %v1367_v13, %v1366_v25  ;;  %v1374_v3 = vrot.slane %v1373_v46, 1  ;;  %v1380_v36 = vadd.f32 %v1379_v61, %v1378_v54  ;;  %2283 = vrcp.f32 %v1361_v33  ;;  %v1434_v9 = vld [vmem:[%s2928_s27 + $0x138] sm:$0xff]  ;;  %v1435_v13 = vld [vmem:[%s2928_s27 + $0x140] sm:$0xff]  ;;  %v1436_v49 = vld [vmem:[%s2928_s27 + $0x148] sm:$0xff] }
 0x17f   : > { %4116 = vst [vmem:[#allocation39_spill] sm:$0xff] %v3463_v1  ;;  %4117 = vst [vmem:[#allocation40_spill] sm:$0xff] %v3466_v55  ;;  %v1433_v55 = vld [vmem:[%s2928_s27 + $0x130] sm:$0xff]  ;;  %v3484_v25 = vadd.f32 %v1420_v52, %v4105_v53  ;;  %v3487_v61 = vadd.f32 %v1421_v6, %v4106_v12  ;;  %v3490_v54 = vadd.f32 %v1422_v17, %v4107_v7  ;;  %v1438_v52 = vld [vmem:[%s2928_s27 + $0x158] sm:$0xff] }
 0x180   : > { %4118 = vst [vmem:[#allocation41_spill] sm:$0xff] %v3469_v34  ;;  %v3481_v34 = vadd.f32 %v1419_v44, %v4104_v35  ;;  %v1375_v0 = vadd.f32 %v1374_v3, %v1373_v46  ;;  %v1381_v33 = vrot.slane %v1380_v36, 1  ;;  %2285 = vrcp.f32 %v1368_v47  ;;  %v1437_v1 = vld [vmem:[%s2928_s27 + $0x150] sm:$0xff]  ;;  %v1439_v6 = vld [vmem:[%s2928_s27 + $0x160] sm:$0xff] }
 0x181   : > { %4120 = vst [vmem:[#allocation43_spill] sm:$0xff] %v3484_v25  ;;  %4121 = vst [vmem:[#allocation44_spill] sm:$0xff] %v3487_v61  ;;  %v3496_v44 = vadd.f32 %v1423_v42, %v3160_v26  ;;  %v1440_v61 = vld [vmem:[%s2928_s27 + $0x168] sm:$0xff]  ;;  %v3502_v17 = vadd.f32 %v1424_v38, %v3162_v23  ;;  %v3505_v46 = vadd.f32 %v1425_v48, %v3167_v30  ;;  %v1443_v25 = vld [vmem:[%s2928_s27 + $0x180] sm:$0xff] }
 0x182   : > { %4122 = vst [vmem:[#allocation45_spill] sm:$0xff] %v3490_v54  ;;  %v3508_v47 = vadd.f32 %v1426_v43, %v3176_v28  ;;  %v3511_v3 = vadd.f32 %v1427_v5, %v3056_v50  ;;  %v1382_v42 = vadd.f32 %v1381_v33, %v1380_v36  ;;  %2287 = vrcp.f32 %v1375_v0  ;;  %v1442_v54 = vld [vmem:[%s2928_s27 + $0x178] sm:$0xff]  ;;  %v1444_v43 = vld [vmem:[%s2928_s27 + $0x188] sm:$0xff]  ;;  %v1445_v5 = vld [vmem:[%s2928_s27 + $0x190] sm:$0xff] }
 0x183   : > { %4123 = vst [vmem:[#allocation46_spill] sm:$0xff] %v3496_v44  ;;  %v1441_v44 = vld [vmem:[%s2928_s27 + $0x170] sm:$0xff]  ;;  %v3517_v38 = vadd.f32 %v1428_v37, %v3058_v51  ;;  %v3520_v48 = vadd.f32 %v1429_v24, %v3084_v10  ;;  %v3526_v36 = vadd.f32 %v1430_v63, %v3086_v11  ;;  %v3529_v0 = vadd.f32 %v1431_v22, %v3090_v14  ;;  %v1447_v24 = vld [vmem:[%s2928_s27 + $0x1a0] sm:$0xff] }
 0x184   : > { %4124 = vst [vmem:[#allocation47_spill] sm:$0xff] %v3508_v47  ;;  %4125 = vst [vmem:[#allocation48_spill] sm:$0xff] %v3511_v3  ;;  %v1446_v3 = vld [vmem:[%s2928_s27 + $0x198] sm:$0xff]  ;;  %v3532_v33 = vadd.f32 %v1432_v32, %v3092_v15  ;;  %v3535_v37 = vadd.f32 %v1433_v55, %v3094_v16  ;;  %2289 = vrcp.f32 %v1382_v42  ;;  %v3541_v47 = vadd.f32 %v1434_v9, %v3099_v18  ;;  %v1451_v55 = vld [vmem:[%s2928_s27 + $0x1c0] sm:$0xff] }
 0x185   : > { %4126 = vst [vmem:[#allocation49_spill] sm:$0xff] %v3517_v38  ;;  %4127 = vst [vmem:[#allocation50_spill] sm:$0xff] %v3520_v48  ;;  %v1448_v48 = vld [vmem:[%s2928_s27 + $0x1a8] sm:$0xff]  ;;  %v1449_v38 = vld [vmem:[%s2928_s27 + $0x1b0] sm:$0xff]  ;;  %v3544_v63 = vadd.f32 %v1435_v13, %v4104_v35  ;;  %v3547_v22 = vadd.f32 %v1436_v49, %v4105_v53  ;;  %v3553_v42 = vadd.f32 %v1437_v1, %v4106_v12 }
 0x186   : > { %4128 = vst [vmem:[#allocation51_spill] sm:$0xff] %v3529_v0  ;;  %4129 = vst [vmem:[#allocation52_spill] sm:$0xff] %v3532_v33  ;;  %v1450_v32 = vld [vmem:[%s2928_s27 + $0x1b8] sm:$0xff]  ;;  %v3556_v33 = vadd.f32 %v1438_v52, %v4107_v7  ;;  %v3559_v9 = vadd.f32 %v1439_v6, %v3160_v26  ;;  %v3562_v13 = vadd.f32 %v1440_v61, %v3162_v23  ;;  %v1456_v6 = vld [vmem:[%s2928_s27 + $0x1e8] sm:$0xff] }
 0x187   : > { %4130 = vst [vmem:[#allocation53_spill] sm:$0xff] %v3535_v37  ;;  %4131 = vst [vmem:[#allocation54_spill] sm:$0xff] %v3541_v47  ;;  %v1452_v37 = vld [vmem:[%s2928_s27 + $0x1c8] sm:$0xff]  ;;  %v1454_v49 = vld [vmem:[%s2928_s27 + $0x1d8] sm:$0xff]  ;;  %v3568_v47 = vadd.f32 %v1441_v44, %v3167_v30  ;;  %v3571_v0 = vadd.f32 %v1442_v54, %v3176_v28  ;;  %v3574_v1 = vadd.f32 %v1443_v25, %v3056_v50 }
 0x188   : > { %4132 = vst [vmem:[#allocation55_spill] sm:$0xff] %v3544_v63  ;;  %4133 = vst [vmem:[#allocation56_spill] sm:$0xff] %v3547_v22  ;;  %v1453_v63 = vld [vmem:[%s2928_s27 + $0x1d0] sm:$0xff]  ;;  %v1455_v22 = vld [vmem:[%s2928_s27 + $0x1e0] sm:$0xff]  ;;  %v3577_v52 = vadd.f32 %v1444_v43, %v3058_v51  ;;  %v3583_v61 = vadd.f32 %v1445_v5, %v3084_v10  ;;  %v3589_v44 = vadd.f32 %v1447_v24, %v3090_v14  ;;  %v2284_v50 = vpop.eup %2283 }
 0x189   : > { %4134 = vst [vmem:[#allocation57_spill] sm:$0xff] %v3556_v33  ;;  %4135 = vst [vmem:[#allocation58_spill] sm:$0xff] %v3559_v9  ;;  %v1457_v9 = vld [vmem:[%s2928_s27 + $0x1f0] sm:$0xff]  ;;  %v1458_v33 = vld [vmem:[%s2928_s27 + $0x1f8] sm:$0xff]  ;;  %v3592_v54 = vadd.f32 %v1448_v48, %v3092_v15  ;;  %v3595_v25 = vadd.f32 %v1449_v38, %v3094_v16  ;;  %v3598_v51 = vadd.f32 %v1450_v32, %v3099_v18  ;;  %s1899_s27 = sshll.u32 %s488_s26, 4  ;;  %s3962_s27 = int_to_ptr.vmem [resolvable:$true] %s1899_s27 }
 0x18a   : > { %4136 = vst [vmem:[#allocation59_spill] sm:$0xff] %v3562_v13  ;;  %v3586_v13 = vadd.f32 %v1446_v3, %v3086_v11  ;;  %v3601_v43 = vadd.f32 %v1451_v55, %v4104_v35  ;;  %v3604_v10 = vadd.f32 %v1452_v37, %v4105_v53  ;;  %v1387_v11 = vmul.f32 %v2284_v50, %v3344_v60  ;;  %v2286_v16 = vpop.eup %2285  ;;  %v4141_v32 = vld [vmem:[#allocation33_spill] sm:$0xff]  ;;  %s2471_s13 = scalar_lea.vmem %s3962_s27, 512  ;;  %p2478_p0 = scmp.lt.s32.totalorder %s3962_s27, %s2476_s18 }
 0x18b   : > { %v1388_v14 = vmul.f32 %v2284_v50, %v3346_v2  ;;  %v3609_v15 = vadd.f32 %v1453_v63, %v4106_v12  ;;  %v3612_v3 = vadd.f32 %v1454_v49, %v4107_v7  ;;  %v3615_v18 = vadd.f32 %v1455_v22, %v3160_v26  ;;  %v4140_v22 = vld [vmem:[#allocation32_spill] sm:$0xff]  ;;  %v4146_v50 = vld [vmem:[#allocation39_spill] sm:$0xff]  ;;  %p2472_p10 = scmp.ne.s32.totalorder %s3962_s27, %s2471_s13  ;;  %p2479_p2 = scmp.lt.s32.totalorder %s2477_s22, %s2471_s13 }
 0x18c   : > { %v3618_v35 = vadd.f32 %v1456_v6, %v3162_v23  ;;  %v3621_v53 = vadd.f32 %v1457_v9, %v3167_v30  ;;  %v3624_v60 = vadd.f32 %v1458_v33, %v3176_v28  ;;  %v1389_v2 = vmul.f32 %v2286_v16, %v3348_v21  ;;  %v2288_v26 = vpop.eup %2287  ;;  %v4142_v9 = vld [vmem:[#allocation35_spill] sm:$0xff] }
 0x18d   : > { %v1390_v12 = vmul.f32 %v2286_v16, %v3355_v58  ;;  %v3629_v7 = vmul.f32 %v3370_v19, %v1387_v11  ;;  %v3632_v38 = vmul.f32 %v3373_v39, %v1388_v14  ;;  %v3635_v23 = vmul.f32 %v3376_v27, %v1387_v11  ;;  %p2473_p8 = pnand %p2472_p10, %p4203_p1  ;;  %p2480_p5 = por %p2479_p2, %p2478_p0 }
 0x18e   : > { %v3638_v30 = vmul.f32 %v3386_v4, %v1388_v14  ;;  %v3641_v28 = vmul.f32 %v3392_v41, %v1387_v11  ;;  %v3644_v21 = vmul.f32 %v3395_v40, %v1388_v14  ;;  %v1391_v58 = vmul.f32 %v2288_v26, %v3359_v20  ;;  %v2290_v27 = vpop.eup %2289  ;;  %v4137_v20 = vld [vmem:[#allocation34_spill] sm:$0xff] }
 0x18f   : > { %v1392_v19 = vmul.f32 %v2288_v26, %v3366_v62  ;;  %v3649_v39 = vmul.f32 %v3398_v56, %v1387_v11  ;;  %v3652_v48 = vmul.f32 %v3401_v57, %v1388_v14  ;;  %v1531_v4 = vmul.f32 %v3410_v59, %v1387_v11  ;;  %v4138_v62 = vld [vmem:[#allocation30_spill] sm:$0xff]  ;;  %v4139_v56 = vld [vmem:[#allocation31_spill] sm:$0xff]  ;;  %v4147_v26 = vld [vmem:[#allocation40_spill] sm:$0xff]  ;;  %p2474_p4 = pneg %p2473_p8 }
 0x190   : > { %v1532_v5 = vmul.f32 %v3413_v8, %v1388_v14  ;;  %v1533_v41 = vmul.f32 %v3416_v29, %v1387_v11  ;;  %v1534_v40 = vmul.f32 %v3419_v31, %v1388_v14  ;;  %v1393_v33 = vmul.f32 %v2290_v27, %v3378_v45  ;;  %v4143_v8 = vld [vmem:[#allocation36_spill] sm:$0xff]  ;;  %v4144_v29 = vld [vmem:[#allocation37_spill] sm:$0xff]  ;;  %v4145_v45 = vld [vmem:[#allocation38_spill] sm:$0xff] }
 0x191   : > { %v1394_v37 = vmul.f32 %v2290_v27, %v4137_v20  ;;  %v1535_v24 = vmul.f32 %v4138_v62, %v1387_v11  ;;  %v1536_v63 = vmul.f32 %v4139_v56, %v1388_v14  ;;  %v1537_v57 = vmul.f32 %v4140_v22, %v1387_v11  ;;  %v4148_v11 = vld [vmem:[#allocation41_spill] sm:$0xff]  ;;  %v4149_v20 = vld [vmem:[#allocation42_spill] sm:$0xff]  ;;  %v4151_v22 = vld [vmem:[#allocation43_spill] sm:$0xff]  ;;  %p2481_p11 = pnand %p2480_p5, %p2474_p4 }
 0x192   : > { %v1538_v55 = vmul.f32 %v4141_v32, %v1388_v14  ;;  %v3665_v59 = vmul.f32 %v4142_v9, %v1389_v2  ;;  %v3668_v49 = vmul.f32 %v4143_v8, %v1390_v12  ;;  %v3671_v31 = vmul.f32 %v4144_v29, %v1389_v2  ;;  %v4153_v9 = vld [vmem:[#allocation44_spill] sm:$0xff]  ;;  %v4155_v29 = vld [vmem:[#allocation45_spill] sm:$0xff] }
 0x193   : > { %v3674_v6 = vmul.f32 %v4145_v45, %v1390_v12  ;;  %v3677_v16 = vmul.f32 %v4146_v50, %v1389_v2  ;;  %v3680_v27 = vmul.f32 %v4147_v26, %v1390_v12  ;;  %v3683_v14 = vmul.f32 %v4148_v11, %v1389_v2  ;;  %v4157_v50 = vld [vmem:[#allocation46_spill] sm:$0xff] }
 0x194   : > { %v3686_v62 = vmul.f32 %v4149_v20, %v1390_v12  ;;  %v3689_v56 = vmul.f32 %v3481_v34, %v1389_v2  ;;  %v3692_v32 = vmul.f32 %v4151_v22, %v1390_v12  ;;  %v3695_v8 = vmul.f32 %v4153_v9, %v1389_v2  ;;  %v4159_v34 = vld [vmem:[#allocation47_spill] sm:$0xff]  ;;  %v4160_v22 = vld [vmem:[#allocation48_spill] sm:$0xff]  ;;  %v4162_v9 = vld [vmem:[#allocation49_spill] sm:$0xff] }
 0x195   : > { %v3698_v45 = vmul.f32 %v4155_v29, %v1390_v12  ;;  %v3701_v26 = vmul.f32 %v4157_v50, %v1389_v2  ;;  %v3704_v11 = vmul.f32 %v3502_v17, %v1390_v12  ;;  %v3707_v20 = vmul.f32 %v3505_v46, %v1389_v2  ;;  %v4164_v29 = vld [vmem:[#allocation50_spill] sm:$0xff]  ;;  %v4166_v17 = vld [vmem:[#allocation51_spill] sm:$0xff]  ;;  %v4168_v46 = vld [vmem:[#allocation52_spill] sm:$0xff] }
 0x196   : > { %4150 = vst [vmem:[#allocation34_spill] sm:$0xff] %v3689_v56  ;;  %4152 = vst [vmem:[#allocation30_spill] sm:$0xff] %v3692_v32  ;;  %v3710_v56 = vmul.f32 %v4159_v34, %v1390_v12  ;;  %v3713_v32 = vmul.f32 %v4160_v22, %v1391_v58  ;;  %v3722_v50 = vmul.f32 %v3526_v36, %v1392_v19  ;;  %v4170_v12 = vld [vmem:[#allocation53_spill] sm:$0xff]  ;;  %v4172_v22 = vld [vmem:[#allocation54_spill] sm:$0xff] }
 0x197   : > { %4154 = vst [vmem:[#allocation31_spill] sm:$0xff] %v3695_v8  ;;  %4156 = vst [vmem:[#allocation32_spill] sm:$0xff] %v3698_v45  ;;  %v3716_v8 = vmul.f32 %v4162_v9, %v1392_v19  ;;  %v3719_v45 = vmul.f32 %v4164_v29, %v1391_v58  ;;  %v3728_v2 = vmul.f32 %v4168_v46, %v1392_v19  ;;  %v4173_v9 = vld [vmem:[#allocation55_spill] sm:$0xff]  ;;  %v4174_v29 = vld [vmem:[#allocation56_spill] sm:$0xff] }
 0x198   : > { %4158 = vst [vmem:[#allocation33_spill] sm:$0xff] %v3704_v11  ;;  %4161 = vst [vmem:[#allocation35_spill] sm:$0xff] %v3713_v32  ;;  %v3725_v11 = vmul.f32 %v4166_v17, %v1391_v58  ;;  %v3731_v34 = vmul.f32 %v4170_v12, %v1391_v58  ;;  %v3734_v32 = vmul.f32 %v4172_v22, %v1392_v19  ;;  %v4175_v17 = vld [vmem:[#allocation57_spill] sm:$0xff]  ;;  %v4176_v46 = vld [vmem:[#allocation58_spill] sm:$0xff] }
 0x199   : > { %4163 = vst [vmem:[#allocation36_spill] sm:$0xff] %v3716_v8  ;;  %4165 = vst [vmem:[#allocation37_spill] sm:$0xff] %v3719_v45  ;;  %v3737_v8 = vmul.f32 %v4173_v9, %v1391_v58  ;;  %v3740_v45 = vmul.f32 %v4174_v29, %v1392_v19  ;;  %v3743_v36 = vmul.f32 %v3553_v42, %v1391_v58  ;;  %v4177_v12 = vld [vmem:[#allocation59_spill] sm:$0xff] }
 0x19a   : > { %4167 = vst [vmem:[#allocation38_spill] sm:$0xff] %v3725_v11  ;;  %4169 = vst [vmem:[#allocation39_spill] sm:$0xff] %v3728_v2  ;;  %v3746_v11 = vmul.f32 %v4175_v17, %v1392_v19  ;;  %v3749_v2 = vmul.f32 %v4176_v46, %v1391_v58  ;;  %v3755_v22 = vmul.f32 %v3568_v47, %v1391_v58 }
 0x19b   : > { %4171 = vst [vmem:[#allocation40_spill] sm:$0xff] %v3731_v34  ;;  %v3752_v34 = vmul.f32 %v4177_v12, %v1392_v19  ;;  %v3758_v9 = vmul.f32 %v3571_v0, %v1392_v19  ;;  %v3761_v29 = vmul.f32 %v3574_v1, %v1393_v33  ;;  %v3764_v42 = vmul.f32 %v3577_v52, %v1394_v37 }
 0x19c   : > { %v3767_v17 = vmul.f32 %v3583_v61, %v1393_v33  ;;  %v3770_v46 = vmul.f32 %v3586_v13, %v1394_v37  ;;  %v3773_v12 = vmul.f32 %v3589_v44, %v1393_v33  ;;  %v3776_v47 = vmul.f32 %v3592_v54, %v1394_v37 }
 0x19d   : > { %v3779_v0 = vmul.f32 %v3595_v25, %v1393_v33  ;;  %v3782_v1 = vmul.f32 %v3598_v51, %v1394_v37  ;;  %v3785_v52 = vmul.f32 %v3601_v43, %v1393_v33  ;;  %v3788_v61 = vmul.f32 %v3604_v10, %v1394_v37 }
 0x19e   : > { %v3791_v13 = vmul.f32 %v3609_v15, %v1393_v33  ;;  %v3794_v44 = vmul.f32 %v3612_v3, %v1394_v37  ;;  %v3797_v54 = vmul.f32 %v3615_v18, %v1393_v33  ;;  %v3800_v25 = vmul.f32 %v3618_v35, %v1394_v37 }
 0x19f   : > { %4178 = vst [vmem:[#allocation41_spill] sm:$0xff] %v3788_v61  ;;  %v3803_v51 = vmul.f32 %v3621_v53, %v1393_v33  ;;  %v3806_v43 = vmul.f32 %v3624_v60, %v1394_v37  ;;  %v1587_v10 = vadd.f32 %v3632_v38, %v3629_v7  ;;  %v1594_v15 = vadd.f32 %v3638_v30, %v3635_v23 }
 0x1a0   : > { %4179 = vst [vmem:[#allocation42_spill] sm:$0xff] %v3791_v13  ;;  %4180 = vst [vmem:[#allocation43_spill] sm:$0xff] %v3794_v44  ;;  %v1601_v3 = vadd.f32 %v3644_v21, %v3641_v28  ;;  %v1608_v18 = vadd.f32 %v3652_v48, %v3649_v39  ;;  %v1615_v35 = vadd.f32 %v1532_v5, %v1531_v4 }
 0x1a1   : > { %4181 = vst [vmem:[#allocation44_spill] sm:$0xff] %v3797_v54  ;;  %4182 = vst [vmem:[#allocation45_spill] sm:$0xff] %v3800_v25  ;;  %v1622_v58 = vadd.f32 %v1534_v40, %v1533_v41  ;;  %v1588_v19 = vrot.slane %v1587_v10, 4  ;;  %v1595_v53 = vrot.slane %v1594_v15, 4  ;;  %v1629_v33 = vadd.f32 %v1536_v63, %v1535_v24 }
 0x1a2   : > { %4183 = vst [vmem:[#allocation46_spill] sm:$0xff] %v3803_v51  ;;  %4184 = vst [vmem:[#allocation47_spill] sm:$0xff] %v3806_v43  ;;  %v1636_v51 = vadd.f32 %v1538_v55, %v1537_v57  ;;  %v1602_v60 = vrot.slane %v1601_v3, 4  ;;  %v1609_v37 = vrot.slane %v1608_v18, 4  ;;  %v1616_v43 = vrot.slane %v1615_v35, 4 }
 0x1a3   : > { %v1623_v25 = vrot.slane %v1622_v58, 4  ;;  %v1589_v7 = vadd.f32 %v1588_v19, %v1587_v10  ;;  %v1596_v38 = vadd.f32 %v1595_v53, %v1594_v15  ;;  %v1630_v54 = vrot.slane %v1629_v33, 4 }
 0x1a4   : > { %v1637_v23 = vrot.slane %v1636_v51, 4  ;;  %v1603_v30 = vadd.f32 %v1602_v60, %v1601_v3  ;;  %v1610_v44 = vadd.f32 %v1609_v37, %v1608_v18  ;;  %v1617_v28 = vadd.f32 %v1616_v43, %v1615_v35 }
 0x1a5   : > { %v1624_v21 = vadd.f32 %v1623_v25, %v1622_v58  ;;  %v1590_v13 = vrot.slane %v1589_v7, 2  ;;  %v1597_v39 = vrot.slane %v1596_v38, 2  ;;  %v1631_v48 = vadd.f32 %v1630_v54, %v1629_v33 }
 0x1a6   : > { %v1638_v4 = vadd.f32 %v1637_v23, %v1636_v51  ;;  %v1604_v5 = vrot.slane %v1603_v30, 2  ;;  %v1611_v41 = vrot.slane %v1610_v44, 2  ;;  %v1618_v40 = vrot.slane %v1617_v28, 2 }
 0x1a7   : > { %v1625_v24 = vrot.slane %v1624_v21, 2  ;;  %v1591_v63 = vadd.f32 %v1590_v13, %v1589_v7  ;;  %v1598_v57 = vadd.f32 %v1597_v39, %v1596_v38  ;;  %v1632_v55 = vrot.slane %v1631_v48, 2 }
 0x1a8   : > { %v1639_v61 = vrot.slane %v1638_v4, 2  ;;  %v1605_v10 = vadd.f32 %v1604_v5, %v1603_v30  ;;  %v1612_v15 = vadd.f32 %v1611_v41, %v1610_v44  ;;  %v1619_v19 = vadd.f32 %v1618_v40, %v1617_v28  ;;  %v4186_v5 = vld [vmem:[#allocation30_spill] sm:$0xff]  ;;  %v4187_v40 = vld [vmem:[#allocation31_spill] sm:$0xff] }
 0x1a9   : > { %v1626_v53 = vadd.f32 %v1625_v24, %v1624_v21  ;;  %v1592_v3 = vrot.slane %v1591_v63, 1  ;;  %v1599_v18 = vrot.slane %v1598_v57, 1  ;;  %v1633_v43 = vadd.f32 %v1632_v55, %v1631_v48  ;;  %v4188_v24 = vld [vmem:[#allocation32_spill] sm:$0xff] }
 0x1aa   : > { %v1640_v25 = vadd.f32 %v1639_v61, %v1638_v4  ;;  %v1606_v35 = vrot.slane %v1605_v10, 1  ;;  %v1613_v58 = vrot.slane %v1612_v15, 1  ;;  %v1620_v54 = vrot.slane %v1619_v19, 1  ;;  %v4185_v4 = vld [vmem:[#allocation34_spill] sm:$0xff] }
 0x1ab   : > { %v1627_v51 = vrot.slane %v1626_v53, 1  ;;  %v3816_v33 = vadd.f32 %v1592_v3, %v1591_v63  ;;  %v3818_v60 = vadd.f32 %v1599_v18, %v1598_v57  ;;  %v1634_v13 = vrot.slane %v1633_v43, 1 }
 0x1ac   : > { %v1641_v37 = vrot.slane %v1640_v25, 1  ;;  %v3820_v7 = vadd.f32 %v1606_v35, %v1605_v10  ;;  %v3822_v38 = vadd.f32 %v1613_v58, %v1612_v15  ;;  %v3824_v44 = vadd.f32 %v1620_v54, %v1619_v19  ;;  %v4189_v10 = vld [vmem:[#allocation33_spill] sm:$0xff] }
 0x1ad   : > { %v3826_v23 = vadd.f32 %v1627_v51, %v1626_v53  ;;  %v3828_v30 = vadd.f32 %v1634_v13, %v1633_v43  ;;  %v1643_v28 = vadd.f32 %v3668_v49, %v3665_v59  ;;  %v1650_v21 = vadd.f32 %v3674_v6, %v3671_v31 }
 0x1ae   : > { %v3830_v61 = vadd.f32 %v1641_v37, %v1640_v25  ;;  %v1657_v39 = vadd.f32 %v3680_v27, %v3677_v16  ;;  %v1664_v48 = vadd.f32 %v3686_v62, %v3683_v14  ;;  %v1671_v41 = vadd.f32 %v4186_v5, %v4185_v4 }
 0x1af   : > { %v1678_v63 = vadd.f32 %v4188_v24, %v4187_v40  ;;  %v1644_v57 = vrot.slane %v1643_v28, 4  ;;  %v1651_v55 = vrot.slane %v1650_v21, 4  ;;  %v1685_v59 = vadd.f32 %v4189_v10, %v3701_v26 }
 0x1b0   : > { %v1692_v49 = vadd.f32 %v3710_v56, %v3707_v20  ;;  %v1658_v31 = vrot.slane %v1657_v39, 4  ;;  %v1665_v6 = vrot.slane %v1664_v48, 4  ;;  %v1672_v16 = vrot.slane %v1671_v41, 4 }
 0x1b1   : > { %v1679_v27 = vrot.slane %v1678_v63, 4  ;;  %v1645_v15 = vadd.f32 %v1644_v57, %v1643_v28  ;;  %v1652_v14 = vadd.f32 %v1651_v55, %v1650_v21  ;;  %v1686_v62 = vrot.slane %v1685_v59, 4 }
 0x1b2   : > { %v1693_v19 = vrot.slane %v1692_v49, 4  ;;  %v1659_v53 = vadd.f32 %v1658_v31, %v1657_v39  ;;  %v1666_v3 = vadd.f32 %v1665_v6, %v1664_v48  ;;  %v1673_v18 = vadd.f32 %v1672_v16, %v1671_v41 }
 0x1b3   : > { %v1680_v43 = vadd.f32 %v1679_v27, %v1678_v63  ;;  %v1646_v25 = vrot.slane %v1645_v15, 2  ;;  %v1653_v35 = vrot.slane %v1652_v14, 2  ;;  %v1687_v58 = vadd.f32 %v1686_v62, %v1685_v59 }
 0x1b4   : > { %v1694_v54 = vadd.f32 %v1693_v19, %v1692_v49  ;;  %v1660_v26 = vrot.slane %v1659_v53, 2  ;;  %v1667_v51 = vrot.slane %v1666_v3, 2  ;;  %v1674_v13 = vrot.slane %v1673_v18, 2 }
 0x1b5   : > { %v1681_v56 = vrot.slane %v1680_v43, 2  ;;  %v1647_v20 = vadd.f32 %v1646_v25, %v1645_v15  ;;  %v1654_v37 = vadd.f32 %v1653_v35, %v1652_v14  ;;  %v1688_v4 = vrot.slane %v1687_v58, 2  ;;  %v4192_v25 = vld [vmem:[#allocation37_spill] sm:$0xff] }
 0x1b6   : > { %v1695_v5 = vrot.slane %v1694_v54, 2  ;;  %v1661_v28 = vadd.f32 %v1660_v26, %v1659_v53  ;;  %v1668_v21 = vadd.f32 %v1667_v51, %v1666_v3  ;;  %v1675_v40 = vadd.f32 %v1674_v13, %v1673_v18  ;;  %v4190_v3 = vld [vmem:[#allocation35_spill] sm:$0xff]  ;;  %v4191_v18 = vld [vmem:[#allocation36_spill] sm:$0xff] }
 0x1b7   : > { %v1682_v24 = vadd.f32 %v1681_v56, %v1680_v43  ;;  %v1648_v39 = vrot.slane %v1647_v20, 1  ;;  %v1655_v48 = vrot.slane %v1654_v37, 1  ;;  %v1689_v41 = vadd.f32 %v1688_v4, %v1687_v58  ;;  %v4193_v58 = vld [vmem:[#allocation38_spill] sm:$0xff]  ;;  %v4195_v51 = vld [vmem:[#allocation40_spill] sm:$0xff] }
 0x1b8   : > { %v1696_v63 = vadd.f32 %v1695_v5, %v1694_v54  ;;  %v1662_v57 = vrot.slane %v1661_v28, 1  ;;  %v1669_v55 = vrot.slane %v1668_v21, 1  ;;  %v1676_v10 = vrot.slane %v1675_v40, 1  ;;  %v4194_v54 = vld [vmem:[#allocation39_spill] sm:$0xff] }
 0x1b9   : > { %v1683_v59 = vrot.slane %v1682_v24, 1  ;;  %v3848_v49 = vadd.f32 %v1648_v39, %v1647_v20  ;;  %v3850_v31 = vadd.f32 %v1655_v48, %v1654_v37  ;;  %v1690_v6 = vrot.slane %v1689_v41, 1 }
 0x1ba   : > { %v1697_v16 = vrot.slane %v1696_v63, 1  ;;  %v3852_v27 = vadd.f32 %v1662_v57, %v1661_v28  ;;  %v3854_v15 = vadd.f32 %v1669_v55, %v1668_v21  ;;  %v3856_v14 = vadd.f32 %v1676_v10, %v1675_v40 }
 0x1bb   : > { %v3858_v62 = vadd.f32 %v1683_v59, %v1682_v24  ;;  %v3860_v19 = vadd.f32 %v1690_v6, %v1689_v41  ;;  %v1699_v43 = vadd.f32 %v4191_v18, %v4190_v3  ;;  %v1706_v35 = vadd.f32 %v3722_v50, %v4192_v25 }
 0x1bc   : > { %v3862_v53 = vadd.f32 %v1697_v16, %v1696_v63  ;;  %v1713_v26 = vadd.f32 %v4194_v54, %v4193_v58  ;;  %v1720_v13 = vadd.f32 %v3734_v32, %v4195_v51  ;;  %v1727_v56 = vadd.f32 %v3740_v45, %v3737_v8 }
 0x1bd   : > { %v1734_v20 = vadd.f32 %v3746_v11, %v3743_v36  ;;  %v1700_v37 = vrot.slane %v1699_v43, 4  ;;  %v1707_v4 = vrot.slane %v1706_v35, 4  ;;  %v1741_v5 = vadd.f32 %v3752_v34, %v3749_v2 }
 0x1be   : > { %v1748_v50 = vadd.f32 %v3758_v9, %v3755_v22  ;;  %v1714_v28 = vrot.slane %v1713_v26, 4  ;;  %v1721_v21 = vrot.slane %v1720_v13, 4  ;;  %v1728_v40 = vrot.slane %v1727_v56, 4 }
 0x1bf   : > { %v1735_v24 = vrot.slane %v1734_v20, 4  ;;  %v1701_v39 = vadd.f32 %v1700_v37, %v1699_v43  ;;  %v1708_v32 = vadd.f32 %v1707_v4, %v1706_v35  ;;  %v1742_v48 = vrot.slane %v1741_v5, 4 }
 0x1c0   : > { %v1749_v41 = vrot.slane %v1748_v50, 4  ;;  %v1715_v8 = vadd.f32 %v1714_v28, %v1713_v26  ;;  %v1722_v45 = vadd.f32 %v1721_v21, %v1720_v13  ;;  %v1729_v63 = vadd.f32 %v1728_v40, %v1727_v56 }
 0x1c1   : > { %v1736_v11 = vadd.f32 %v1735_v24, %v1734_v20  ;;  %v1702_v36 = vrot.slane %v1701_v39, 2  ;;  %v1709_v57 = vrot.slane %v1708_v32, 2  ;;  %v1743_v55 = vadd.f32 %v1742_v48, %v1741_v5 }
 0x1c2   : > { %v1750_v10 = vadd.f32 %v1749_v41, %v1748_v50  ;;  %v1716_v2 = vrot.slane %v1715_v8, 2  ;;  %v1723_v34 = vrot.slane %v1722_v45, 2  ;;  %v1730_v59 = vrot.slane %v1729_v63, 2 }
 0x1c3   : > { %v1737_v22 = vrot.slane %v1736_v11, 2  ;;  %v1703_v9 = vadd.f32 %v1702_v36, %v1701_v39  ;;  %v1710_v6 = vadd.f32 %v1709_v57, %v1708_v32  ;;  %v1744_v16 = vrot.slane %v1743_v55, 2  ;;  %v4197_v57 = vld [vmem:[#allocation42_spill] sm:$0xff] }
 0x1c4   : > { %v1751_v3 = vrot.slane %v1750_v10, 2  ;;  %v1717_v18 = vadd.f32 %v1716_v2, %v1715_v8  ;;  %v1724_v43 = vadd.f32 %v1723_v34, %v1722_v45  ;;  %v1731_v25 = vadd.f32 %v1730_v59, %v1729_v63  ;;  %v4199_v59 = vld [vmem:[#allocation44_spill] sm:$0xff] }
 0x1c5   : > { %v1738_v35 = vadd.f32 %v1737_v22, %v1736_v11  ;;  %v1704_v58 = vrot.slane %v1703_v9, 1  ;;  %v1711_v54 = vrot.slane %v1710_v6, 1  ;;  %v1745_v26 = vadd.f32 %v1744_v16, %v1743_v55  ;;  %v4196_v11 = vld [vmem:[#allocation41_spill] sm:$0xff]  ;;  %v4198_v55 = vld [vmem:[#allocation43_spill] sm:$0xff] }
 0x1c6   : > { %v1752_v51 = vadd.f32 %v1751_v3, %v1750_v10  ;;  %v1718_v13 = vrot.slane %v1717_v18, 1  ;;  %v1725_v56 = vrot.slane %v1724_v43, 1  ;;  %v1732_v20 = vrot.slane %v1731_v25, 1  ;;  %v4200_v22 = vld [vmem:[#allocation45_spill] sm:$0xff] }
 0x1c7   : > { %v1739_v37 = vrot.slane %v1738_v35, 1  ;;  %v3880_v4 = vadd.f32 %v1704_v58, %v1703_v9  ;;  %v3882_v5 = vadd.f32 %v1711_v54, %v1710_v6  ;;  %v1746_v50 = vrot.slane %v1745_v26, 1  ;;  %v4202_v9 = vld [vmem:[#allocation47_spill] sm:$0xff] }
 0x1c8   : > { %v1753_v28 = vrot.slane %v1752_v51, 1  ;;  %v3884_v21 = vadd.f32 %v1718_v13, %v1717_v18  ;;  %v3886_v40 = vadd.f32 %v1725_v56, %v1724_v43  ;;  %v3888_v24 = vadd.f32 %v1732_v20, %v1731_v25 }
 0x1c9   : > { %v3890_v39 = vadd.f32 %v1739_v37, %v1738_v35  ;;  %v3892_v32 = vadd.f32 %v1746_v50, %v1745_v26  ;;  %v1755_v41 = vadd.f32 %v3764_v42, %v3761_v29  ;;  %v1762_v8 = vadd.f32 %v3770_v46, %v3767_v17  ;;  %v4201_v42 = vld [vmem:[#allocation46_spill] sm:$0xff] }
 0x1ca   : > { %v3894_v48 = vadd.f32 %v1753_v28, %v1752_v51  ;;  %v1769_v45 = vadd.f32 %v3776_v47, %v3773_v12  ;;  %v1776_v63 = vadd.f32 %v3782_v1, %v3779_v0  ;;  %v1783_v36 = vadd.f32 %v4196_v11, %v3785_v52 }
 0x1cb   : > { %v1790_v10 = vadd.f32 %v4198_v55, %v4197_v57  ;;  %v1756_v2 = vrot.slane %v1755_v41, 4  ;;  %v1763_v34 = vrot.slane %v1762_v8, 4  ;;  %v1797_v29 = vadd.f32 %v4200_v22, %v4199_v59 }
 0x1cc   : > { %v1804_v17 = vadd.f32 %v4202_v9, %v4201_v42  ;;  %v1770_v46 = vrot.slane %v1769_v45, 4  ;;  %v1777_v6 = vrot.slane %v1776_v63, 4  ;;  %v1784_v12 = vrot.slane %v1783_v36, 4 }
 0x1cd   : > { %v1791_v47 = vrot.slane %v1790_v10, 4  ;;  %v1757_v0 = vadd.f32 %v1756_v2, %v1755_v41  ;;  %v1764_v1 = vadd.f32 %v1763_v34, %v1762_v8  ;;  %v1798_v16 = vrot.slane %v1797_v29, 4 }
 0x1ce   : > { %v1805_v52 = vrot.slane %v1804_v17, 4  ;;  %v1771_v3 = vadd.f32 %v1770_v46, %v1769_v45  ;;  %v1778_v18 = vadd.f32 %v1777_v6, %v1776_v63  ;;  %v1785_v43 = vadd.f32 %v1784_v12, %v1783_v36 }
 0x1cf   : > { %v1792_v25 = vadd.f32 %v1791_v47, %v1790_v10  ;;  %v1758_v35 = vrot.slane %v1757_v0, 2  ;;  %v1765_v58 = vrot.slane %v1764_v1, 2  ;;  %v1799_v54 = vadd.f32 %v1798_v16, %v1797_v29 }
 0x1d0   : > { %v1806_v26 = vadd.f32 %v1805_v52, %v1804_v17  ;;  %v1772_v51 = vrot.slane %v1771_v3, 2  ;;  %v1779_v13 = vrot.slane %v1778_v18, 2  ;;  %v1786_v56 = vrot.slane %v1785_v43, 2 }
 0x1d1   : > { %v1793_v20 = vrot.slane %v1792_v25, 2  ;;  %v1759_v37 = vadd.f32 %v1758_v35, %v1757_v0  ;;  %v1766_v50 = vadd.f32 %v1765_v58, %v1764_v1  ;;  %v1800_v28 = vrot.slane %v1799_v54, 2 }
 0x1d2   : > { %v1807_v41 = vrot.slane %v1806_v26, 2  ;;  %v1773_v8 = vadd.f32 %v1772_v51, %v1771_v3  ;;  %v1780_v45 = vadd.f32 %v1779_v13, %v1778_v18  ;;  %v1787_v63 = vadd.f32 %v1786_v56, %v1785_v43 }
 0x1d3   : > { %v1794_v11 = vadd.f32 %v1793_v20, %v1792_v25  ;;  %v1760_v36 = vrot.slane %v1759_v37, 1  ;;  %v1767_v57 = vrot.slane %v1766_v50, 1  ;;  %v1801_v55 = vadd.f32 %v1800_v28, %v1799_v54 }
 0x1d4   : > { %v1808_v10 = vadd.f32 %v1807_v41, %v1806_v26  ;;  %v1774_v2 = vrot.slane %v1773_v8, 1  ;;  %v1781_v34 = vrot.slane %v1780_v45, 1  ;;  %v1788_v59 = vrot.slane %v1787_v63, 1 }
 0x1d5   : > { %v1795_v22 = vrot.slane %v1794_v11, 1  ;;  %v1761_v29 = vadd.f32 %v1760_v36, %v1759_v37  ;;  %v1768_v42 = vadd.f32 %v1767_v57, %v1766_v50  ;;  %v1802_v9 = vrot.slane %v1801_v55, 1 }
 0x1d6   : > { %v1809_v17 = vrot.slane %v1808_v10, 1  ;;  %v1775_v46 = vadd.f32 %v1774_v2, %v1773_v8  ;;  %v1782_v6 = vadd.f32 %v1781_v34, %v1780_v45  ;;  %v1789_v12 = vadd.f32 %v1788_v59, %v1787_v63 }
 0x1d7   : > { %v1796_v47 = vadd.f32 %v1795_v22, %v1794_v11  ;;  %v1803_v0 = vadd.f32 %v1802_v9, %v1801_v55  ;;  %v1844_v16 = vsel %vm1843_vm0, %v3818_v60, %v3816_v33  ;;  %v1857_v52 = vsel %vm1843_vm0, %v3850_v31, %v3848_v49 }
 0x1d8   : > { %v1810_v1 = vadd.f32 %v1809_v17, %v1808_v10  ;;  %v1846_v3 = vsel %vm1845_vm1, %v3820_v7, %v1844_v16  ;;  %v1858_v18 = vsel %vm1845_vm1, %v3852_v27, %v1857_v52  ;;  %v1864_v43 = vsel %vm1843_vm0, %v3882_v5, %v3880_v4 }
 0x1d9   : > { %v1871_v25 = vsel %vm1843_vm0, %v1768_v42, %v1761_v29  ;;  %v1848_v33 = vsel %vm1847_vm2, %v3822_v38, %v1846_v3  ;;  %v1859_v60 = vsel %vm1847_vm2, %v3854_v15, %v1858_v18  ;;  %v1865_v49 = vsel %vm1845_vm1, %v3884_v21, %v1864_v43 }
 0x1da   : > { %v1872_v7 = vsel %vm1845_vm1, %v1775_v46, %v1871_v25  ;;  %v1850_v31 = vsel %vm1849_vm3, %v3824_v44, %v1848_v33  ;;  %v1860_v27 = vsel %vm1849_vm3, %v3856_v14, %v1859_v60  ;;  %v1866_v38 = vsel %vm1847_vm2, %v3886_v40, %v1865_v49 }
 0x1db   : > { %v1873_v4 = vsel %vm1847_vm2, %v1782_v6, %v1872_v7  ;;  %v1852_v15 = vsel %vm1851_vm4, %v3826_v23, %v1850_v31  ;;  %v1861_v5 = vsel %vm1851_vm4, %v3858_v62, %v1860_v27  ;;  %v1867_v21 = vsel %vm1849_vm3, %v3888_v24, %v1866_v38 }
 0x1dc   : > { %v1874_v35 = vsel %vm1849_vm3, %v1789_v12, %v1873_v4  ;;  %v1854_v44 = vsel %vm1853_vm5, %v3828_v30, %v1852_v15  ;;  %v1862_v23 = vsel %vm1853_vm5, %v3860_v19, %v1861_v5  ;;  %v1868_v14 = vsel %vm1851_vm4, %v3890_v39, %v1867_v21 }
 0x1dd   : > { %v1875_v62 = vsel %vm1851_vm4, %v1796_v47, %v1874_v35  ;;  %v1856_v40 = vsel %vm1855_vm6, %v3830_v61, %v1854_v44  ;;  %v1863_v24 = vsel %vm1855_vm6, %v3862_v53, %v1862_v23  ;;  %v1869_v30 = vsel %vm1853_vm5, %v3892_v32, %v1868_v14 }
 0x1de   : > { %v1876_v19 = vsel %vm1853_vm5, %v1803_v0, %v1875_v62  ;;  %v1870_v39 = vsel %vm1855_vm6, %v3894_v48, %v1869_v30  ;;  %1882 = vst [vmem:[%s488_s26] sm:$0xff] %v1856_v40  ;;  %1883 = vst [vmem:[%s488_s26 + $0x8] sm:$0xff] %v1863_v24 }
 0x1df   : > { %v1877_v58 = vsel %vm1855_vm6, %v1810_v1, %v1876_v19  ;;  %1884 = vst [vmem:[%s488_s26 + $0x10] sm:$0xff] %v1870_v39 }
 0x1e0   : > { %1885 = vst [vmem:[%s488_s26 + $0x18] sm:$0xff] %v1877_v58 }
 0x1e1   : > { %2484 = shalt.err (!%p2481_p11)
}
 0x1e2   : > { %s2485_s15 = scalar_lea.hbm %s3953_s20, 512  ;;  %s2489_s11 = scalar_lea.hbm %s4024_s8, 1024 }
 0x1e3   : > { %p2486_p3 = scmp.ne.s32.totalorder %s3953_s20, %s2485_s15  ;;  %p2490_p9 = scmp.lt.u32.totalorder %s3953_s20, %s4024_s8 }
 0x1e4   : > { %p2491_p6 = scmp.lt.u32.totalorder %s2489_s11, %s2485_s15  ;;  %p2493_p10 = scmp.lt.u32.totalorder %s2485_s15, %s3953_s20 }
 0x1e5   : > { %p2487_p13 = pnand %p2486_p3, %p4203_p1 }
 0x1e6   : > { %p2492_p12 = por %p2491_p6, %p2490_p9 }
 0x1e7   : > { %p2488_p7 = pneg %p2487_p13 }
 0x1e8   : > { %p2494_p8 = por %p2493_p10, %p2492_p12 }
 0x1ea   : > { %p2495_p4 = pnand %p2494_p8, %p2488_p7 }
 0x1ec   : > { %2498 = shalt.err (!%p2495_p4)
}
 0x1ed   : > { %s2574_s16 = smov 128   ;;  %s2575_s25 = smov 256  }
 0x1ee   : > { %s2576_s14 = smov 8  }
 0x1ef   : > { %2180 = dma.vmem_to_hbm [thread:$0]  (%p4203_p1), %s3962_s27, 512, %s3953_s20, %s1887_s21, %s2574_s16, %s2575_s25, %s2576_s14  }
 0x1f0 PF: > { %s4204_s5 = sld [smem:[#allocation25_spill]]  ;;  %s4205_s12 = sld [smem:[#allocation29_spill]] }
 0x1f1   : > { %p4207_p2 = scmp.ge.s32.totalorder %s2557_s30, 2 }
 0x1f6   : > { %s1914_s26 = sand.u32 1, %s4204_s5   ;;  %p4206_p0 = scmp.ne.s32.totalorder %s4205_s12, 0 }
 0x1f7   : > { %s1915_s9 = scalar_lea.sflag [#allocation4], %s1914_s26 }
 0x1f8   : > { %p2209_p5 = pnand %p4207_p2, %p4206_p0 }
 0x1fa   : > { %2540 = dma.done.wait (!%p2209_p5), %s1915_s9, 512  }
 0x1fb   : > { %2542 = vsyncadd (!%p2209_p5), %s1915_s9, 4294966784  ;;  %s4208_s30 = sld [smem:[#allocation27_spill]]  ;;  %s4209_s24 = sld [smem:[#allocation26_spill]] }
 0x1fc   : > { %s4210_s29 = sld [smem:[#allocation28_spill]]  ;;  %s4211_s27 = smov %s2549_s28 }
 0x201   : > { %p30_p11 = scmp.ge.s32.totalorder %s4208_s30, 4   ;;  %s4212_s28 = smov %s4209_s24 }
 0x203   :  { %32 = sbr.rel (!%p30_p11) target bundleno = 16 (0x10), region = 151 }
 0x20a   :  { %1920 = vsyncpa [#allocation3], 1 }
 0x20b   :  { %1922 = vsyncpa [#allocation3 + $0x1], 1 }
 0x20c   :  { %1923 = vsyncpa [#allocation13], 1 }
 0x20d   :  { %1925 = vsyncpa [#allocation13 + $0x1], 1 }
 0x20e   :  { %1926 = vsyncpa [#allocation16], 1 }
 0x20f   :  { %1928 = vsyncpa [#allocation16 + $0x1], 1 }
 0x210   :  { %1929 = vsyncpa [#allocation4], 1 }
 0x211   :  { %1931 = vsyncpa [#allocation4 + $0x1], 1 }
 0x212   :  { %1932 = vsyncpa [#allocation5], 1 }
 0x213   :  { %1934 = vsyncpa [#allocation5 + $0x1], 1 }
 0x214   :  { %1935 = vsyncpa [#allocation7], 1 }
 0x215   :  { %1936 = vsyncpa [#allocation10], 1 }

</bundles_post_ra>
